<compile_context>
chip_gen: v7x
topology: tpu7x:2x2x1
jax: 0.10.0
libtpu: 0.0.40
codegen_flags: <defaults>
</compile_context>

<pallas_src>
import functools

import jax
import jax.numpy as jnp
from jax.experimental import pallas as pl
from jax.experimental.pallas import tpu as pltpu


# --------------------------------------------------------------------------
# Kernel
# --------------------------------------------------------------------------
def _self_attention_kernel(x_ref, w_in_ref, w_out_ref, b_out_ref, o_ref, *,
                           num_heads: int, flat_out: bool, fused_out_proj: bool):
    """One batch tile per grid step.

    x_ref     : (B_TILE, ns, dim)        input tile (f32 or bf16)
    w_in_ref  : (dim, 3*dim)             proj_in weight^T, q-cols pre-scaled
    w_out_ref : (dim, dim)               proj_out weight^T (in, out)
    b_out_ref : (1, dim)                 proj_out bias (f32)
    o_ref     : (B_TILE, 1, ns*dim)  if flat_out  (lane-dense store)
                (B_TILE, ns, dim)    otherwise
    """
    bt, ns, dim = x_ref.shape
    dh = dim // num_heads
    rows = bt * ns

    # One big QKV projection over all B_TILE*ns rows (single MXU pass).
    x = x_ref[...].reshape(rows, dim)                        # leading-dim collapse
    qkv = jnp.dot(x, w_in_ref[...],
                  preferred_element_type=jnp.float32)        # (rows, 3*dim) f32
    qkv = qkv.reshape(bt, ns, 3 * dim)

    w_out = w_out_ref[...]                                   # resident weight

    head_outs = []
    acc = None
    for h in range(num_heads):                               # short static loop
        qh = qkv[:, :, h * dh:(h + 1) * dh]                  # scale pre-folded
        kh = qkv[:, :, dim + h * dh:dim + (h + 1) * dh]
        vh = qkv[:, :, 2 * dim + h * dh:2 * dim + (h + 1) * dh]

        # scores: contract dh directly (batched over the batch-tile dim).
        s = jnp.einsum('bqd,bkd->bqk', qh, kh,
                       preferred_element_type=jnp.float32)   # (bt, ns, ns)
        s = s - jnp.max(s, axis=-1, keepdims=True)
        p = jnp.exp(s)
        p = p * pl.reciprocal(jnp.sum(p, axis=-1, keepdims=True), approx=True)

        oh = jnp.einsum('bqk,bkd->bqd', p, vh,
                        preferred_element_type=jnp.float32)  # (bt, ns, dh) f32

        if fused_out_proj:
            head_outs.append(oh)
        else:
            # Fallback path (previously validated): per-head output projection
            # against sublane-aligned row slices of w_out^T.
            term = jnp.dot(oh.reshape(rows, dh).astype(w_out.dtype),
                           w_out[h * dh:(h + 1) * dh, :],
                           preferred_element_type=jnp.float32)
            acc = term if acc is None else acc + term

    if fused_out_proj:
        # One head-concat + a single full-K output projection (better MXU
        # utilization than num_heads matmuls with K=dh).
        o_all = jnp.concatenate(head_outs, axis=-1).reshape(rows, dim)
        acc = jnp.dot(o_all.astype(w_out.dtype), w_out,
                      preferred_element_type=jnp.float32)

    y = acc + b_out_ref[...]                                 # (rows, dim) f32

    if flat_out:
        # Lane-dense store: regroup ns rows of width dim into one ns*dim row.
        o_ref[...] = y.reshape(bt, 1, ns * dim).astype(o_ref.dtype)
    else:
        o_ref[...] = y.reshape(bt, ns, dim).astype(o_ref.dtype)


# --------------------------------------------------------------------------
# Hardware introspection helpers (host-side, best effort)
# --------------------------------------------------------------------------
def _tpu_device_kind() -> str:
    try:
        return jax.devices()[0].device_kind.lower()
    except Exception:
        return ""


def _tpu_generation() -> int:
    kind = _tpu_device_kind()
    for g in (7, 6, 5, 4, 3, 2):
        if f"v{g}" in kind:
            return g
    if "7x" in kind:
        return 7
    return 0


def _num_tensorcores_per_device() -> int:
    """2 TensorCores share one JAX device on v4 / v5p (megacore) and v7x."""
    kind = _tpu_device_kind()
    gen = _tpu_generation()
    if gen >= 7 or gen == 4 or "v5p" in kind:
        return 2
    return 1


def _vmem_capacity_bytes() -> int:
    try:
        info = pltpu.get_tpu_info()
        cap = getattr(info, "vmem_capacity_bytes", None)
        if cap:
            return int(cap)
    except Exception:
        pass
    gen = _tpu_generation()
    if gen in (5, 6):
        return 128 * 1024 * 1024
    return 64 * 1024 * 1024          # conservative default (v7x / unknown)


# --------------------------------------------------------------------------
# Tiling / VMEM budgeting
# --------------------------------------------------------------------------
def _vmem_need_bytes(b_tile, ns, dim, num_heads, in_itemsize, weight_buffers):
    """Rough per-step VMEM footprint estimate (blocks + resident weights +
    f32 intermediates, with 2x slack for relayout copies)."""
    f32 = 4
    rows = b_tile * ns
    dh = dim // num_heads
    x_blk = 2 * rows * dim * in_itemsize                          # double-buffered in
    out_blk = 2 * rows * dim * f32                                # double-buffered out
    weights = (weight_buffers * (3 * dim * dim + dim * dim) * in_itemsize
               + 2 * dim * f32)
    qkv = rows * 3 * dim * f32
    attn = 2 * b_tile * ns * ns * f32 + rows * dh * f32
    combine = 2 * rows * dim * f32
    interm = qkv + attn + combine
    return x_blk + out_blk + weights + 2 * interm + (1 << 20)


def _choose_batch_tile(bs, ns, dim, num_heads, *, gen, num_tc, vmem_budget,
                       in_itemsize, weight_buffers):
    """Largest batch-tile divisor of bs that (a) fits the VMEM budget,
    (b) keeps >= 2 grid steps only on 2-TC chips, and (c) keeps the matmul
    row count near the generation-appropriate MXU target."""
    target_rows = 512 if gen >= 6 else 256
    divisors = [d for d in range(1, bs + 1) if bs % d == 0]
    feasible = [d for d in divisors
                if _vmem_need_bytes(d, ns, dim, num_heads, in_itemsize,
                                    weight_buffers) <= vmem_budget]
    if not feasible:
        feasible = [1]
    if num_tc >= 2 and bs >= 2:
        multi = [d for d in feasible if bs // d >= 2]
        if multi:
            feasible = multi
    within = [d for d in feasible if d * ns <= target_rows]
    return max(within) if within else min(feasible)


# --------------------------------------------------------------------------
# pallas_call wrapper
# --------------------------------------------------------------------------
def _self_attention_pallas(x, w_in_t, w_out_t, b_out_2d, *, num_heads, b_tile,
                           out_dtype, flat_out, fused_out_proj,
                           vmem_limit_bytes, single_buffer_weights):
    bs, ns, dim = x.shape
    grid = (bs // b_tile,)

    kernel = functools.partial(_self_attention_kernel, num_heads=num_heads,
                               flat_out=flat_out, fused_out_proj=fused_out_proj)

    # Resident weights: single-buffer them once the double-buffer is big
    # enough to matter (saves VMEM on v7x's 64 MiB).
    w_kwargs = {"pipeline_mode": pl.Buffered(1)} if single_buffer_weights else {}

    in_specs = [
        pl.BlockSpec((b_tile, ns, dim), lambda b: (b, 0, 0)),
        pl.BlockSpec((dim, 3 * dim), lambda b: (0, 0), **w_kwargs),
        pl.BlockSpec((dim, dim), lambda b: (0, 0), **w_kwargs),
        pl.BlockSpec((1, dim), lambda b: (0, 0)),
    ]
    if flat_out:
        out_shape = jax.ShapeDtypeStruct((bs, 1, ns * dim), out_dtype)
        out_spec = pl.BlockSpec((b_tile, 1, ns * dim), lambda b: (b, 0, 0))
    else:
        out_shape = jax.ShapeDtypeStruct((bs, ns, dim), out_dtype)
        out_spec = pl.BlockSpec((b_tile, ns, dim), lambda b: (b, 0, 0))

    return pl.pallas_call(
        kernel,
        out_shape=out_shape,
        grid=grid,
        in_specs=in_specs,
        out_specs=out_spec,
        compiler_params=pltpu.CompilerParams(
            dimension_semantics=("parallel",),
            vmem_limit_bytes=int(vmem_limit_bytes)),
    )(x, w_in_t, w_out_t, b_out_2d)


def self_attention(x, w_in, w_out, b_out, *, num_heads: int, mxu_dtype=None):
    """x: (bs, ns, dim); w_in: (3*dim, dim); w_out: (dim, dim); b_out: (dim,)
    (PyTorch nn.Linear weight layouts).  mxu_dtype=None -> bf16 on v6e/v7x,
    f32 otherwise."""
    bs, ns, dim = x.shape
    assert dim % num_heads == 0
    dh = dim // num_heads
    scale = dh ** -0.5

    gen = _tpu_generation()
    num_tc = _num_tensorcores_per_device()
    if mxu_dtype is None:
        mxu_dtype = jnp.bfloat16 if gen >= 6 else jnp.float32

    # Host-side (free) weight prep: transpose to (in, out) layout and fold the
    # softmax scale into the q-producing columns of w_in^T in f32, *then* cast
    # to the MXU input dtype.
    w_in_t = jnp.transpose(w_in).astype(jnp.float32)          # (dim, 3*dim)
    w_in_t = w_in_t.at[:, :dim].multiply(scale)
    w_out_t = jnp.transpose(w_out).astype(jnp.float32)        # (dim, dim)
    b_out_2d = b_out.reshape(1, dim).astype(jnp.float32)

    x_in = x.astype(mxu_dtype)
    w_in_t = w_in_t.astype(mxu_dtype)
    w_out_t = w_out_t.astype(mxu_dtype)

    in_itemsize = jnp.dtype(mxu_dtype).itemsize
    weight_bytes = (3 * dim * dim + dim * dim) * in_itemsize
    single_buffer_weights = weight_bytes > (4 << 20)
    weight_buffers = 1 if single_buffer_weights else 2

    vmem_budget = max(32 << 20, int(0.75 * _vmem_capacity_bytes()))
    b_tile = _choose_batch_tile(bs, ns, dim, num_heads, gen=gen, num_tc=num_tc,
                                vmem_budget=vmem_budget, in_itemsize=in_itemsize,
                                weight_buffers=weight_buffers)

    # Ordered attempts: (flat lane-dense store?, fused full-K out projection?).
    # The last entry is the previously-validated conservative layout, used only
    # if the Mosaic build rejects the minor-dim reshape / concat lowering.
    want_flat = (dim % 128) != 0
    configs = [(want_flat, True)]
    if want_flat:
        configs.append((False, True))
    configs.append((False, False))

    last_err = None
    for flat_out, fused_out_proj in configs:
        try:
            out = _self_attention_pallas(
                x_in, w_in_t, w_out_t, b_out_2d,
                num_heads=num_heads, b_tile=b_tile, out_dtype=x.dtype,
                flat_out=flat_out, fused_out_proj=fused_out_proj,
                vmem_limit_bytes=vmem_budget,
                single_buffer_weights=single_buffer_weights)
            out = jax.block_until_ready(out)
            if flat_out:
                out = out.reshape(bs, ns, dim)
            return out
        except Exception as e:                    # lowering fallback only
            last_err = e
    raise last_err


# --------------------------------------------------------------------------
# Pure-JAX reference (mirrors the PyTorch forward exactly)
# --------------------------------------------------------------------------
def self_attention_ref(x, w_in, w_out, b_out, *, num_heads: int):
    bs, ns, dim = x.shape
    dh = dim // num_heads
    scale = dh ** -0.5
    qkv = x @ w_in.T                                          # Linear, no bias
    qkv = qkv.reshape(bs, ns, 3, num_heads, dh).transpose(2, 0, 3, 1, 4)
    q, k, v = qkv[0], qkv[1], qkv[2]                          # (bs, H, ns, dh)
    att = jnp.einsum('bhqd,bhkd->bhqk', q, k) * scale
    att = jax.nn.softmax(att, axis=-1)
    o = jnp.einsum('bhqk,bhkd->bhqd', att, v)
    o = o.transpose(0, 2, 1, 3).reshape(bs, ns, dim)
    return o @ w_out.T + b_out


# --------------------------------------------------------------------------
if __name__ == "__main__":
    # Small shapes consistent with the module: dim_hidden=32, num_heads=4.
    bs, ns, dim_hidden, num_heads = 2, 8, 32, 4

    key = jax.random.PRNGKey(0)
    kx, kw_in, kw_out, kb_out = jax.random.split(key, 4)

    x = jax.random.normal(kx, (bs, ns, dim_hidden), dtype=jnp.float32)
    # nn.Linear weights: proj_in (3*dim, dim), no bias (qkv_bias=False);
    # proj_out (dim, dim) with bias.
    w_in = jax.random.normal(kw_in, (3 * dim_hidden, dim_hidden),
                             dtype=jnp.float32) * 0.1
    w_out = jax.random.normal(kw_out, (dim_hidden, dim_hidden),
                              dtype=jnp.float32) * 0.1
    b_out = jax.random.normal(kb_out, (dim_hidden,), dtype=jnp.float32) * 0.1

    ref = self_attention_ref(x, w_in, w_out, b_out, num_heads=num_heads)

    # f32 MXU path (all generations).  Tolerance covers the EUP approximate
    # reciprocal in the softmax denominator.
    out = self_attention(x, w_in, w_out, b_out, num_heads=num_heads,
                         mxu_dtype=jnp.float32)
    out = jax.block_until_ready(out)
    assert out.shape == (bs, ns, dim_hidden)
    assert jnp.allclose(out, ref, atol=2e-3, rtol=2e-3), "f32 mismatch vs reference"

    # bf16 MXU-input path (v6e / v7x only): halves weight/activation DMA bytes
    # and uses the fast bf16 MXU path; accumulation and softmax stay f32.
    if _tpu_generation() >= 6:
        out_bf16 = jax.block_until_ready(
            self_attention(x, w_in, w_out, b_out, num_heads=num_heads,
                           mxu_dtype=jnp.bfloat16))
        assert jnp.allclose(out_bf16, ref, atol=3e-2, rtol=3e-2), \
            "bf16 mismatch vs reference"

    print("KERNEL_OK")
</pallas_src>

<mosaic_0001>
module attributes {stable_mosaic.version = 11 : i64} {
  func.func @_self_attention_kernel(%arg0: i32, %arg1: memref<2x8x32xf32, #tpu.memory_space<vmem>>, %arg2: memref<32x96xf32, #tpu.memory_space<vmem>>, %arg3: memref<32x32xf32, #tpu.memory_space<vmem>>, %arg4: memref<1x32xf32, #tpu.memory_space<vmem>>, %arg5: memref<2x1x256xf32, #tpu.memory_space<vmem>>) attributes {dimension_semantics = [#tpu.dimension_semantics<parallel>], iteration_bounds = array<i64: 1>, scalar_prefetch = 0 : i64, scratch_operands = 0 : i64, tpu.core_type = #tpu.core_type<tc>, window_params = [{transform_indices = @transform_0, window_bounds = array<i64: 2, 8, 32>}, {pipeline_mode = #tpu.pipeline_mode<synchronous>, transform_indices = @transform_1, window_bounds = array<i64: 32, 96>}, {pipeline_mode = #tpu.pipeline_mode<synchronous>, transform_indices = @transform_2, window_bounds = array<i64: 32, 32>}, {pipeline_mode = #tpu.pipeline_mode<synchronous>, transform_indices = @transform_3, window_bounds = array<i64: 1, 32>}, {transform_indices = @transform_4, window_bounds = array<i64: 2, 1, 256>}]} {
    %c0 = arith.constant 0 : index
    %c0_0 = arith.constant 0 : index
    %c0_1 = arith.constant 0 : index
    %0 = vector.load %arg1[%c0, %c0_0, %c0_1] : memref<2x8x32xf32, #tpu.memory_space<vmem>>, vector<2x8x32xf32>
    %1 = vector.shape_cast %0 : vector<2x8x32xf32> to vector<16x32xf32>
    %c0_2 = arith.constant 0 : index
    %c0_3 = arith.constant 0 : index
    %2 = vector.load %arg2[%c0_2, %c0_3] : memref<32x96xf32, #tpu.memory_space<vmem>>, vector<32x96xf32>
    %cst = arith.constant dense<0.000000e+00> : vector<16x96xf32>
    %3 = tpu.matmul %1, %2, %cst {dimension_numbers = #tpu.dot_dimension_numbers<[1], [0], [0], [1], [0, 0, 1, 1], [], []>} : vector<16x32xf32>, vector<32x96xf32>, vector<16x96xf32> -> vector<16x96xf32>
    %4 = vector.shape_cast %3 : vector<16x96xf32> to vector<2x8x96xf32>
    %c0_4 = arith.constant 0 : index
    %c0_5 = arith.constant 0 : index
    %5 = vector.load %arg3[%c0_4, %c0_5] : memref<32x32xf32, #tpu.memory_space<vmem>>, vector<32x32xf32>
    %6 = vector.extract_strided_slice %4 {offsets = [0, 0, 0], sizes = [2, 8, 8], strides = [1, 1, 1]} : vector<2x8x96xf32> to vector<2x8x8xf32>
    %7 = vector.extract_strided_slice %4 {offsets = [0, 0, 32], sizes = [2, 8, 8], strides = [1, 1, 1]} : vector<2x8x96xf32> to vector<2x8x8xf32>
    %8 = vector.extract_strided_slice %4 {offsets = [0, 0, 64], sizes = [2, 8, 8], strides = [1, 1, 1]} : vector<2x8x96xf32> to vector<2x8x8xf32>
    "tpu.trace_start"() <{level = 10 : i32, message = "bqd,bkd->bqk"}> : () -> ()
    %cst_6 = arith.constant dense<0.000000e+00> : vector<2x8x8xf32>
    %9 = tpu.matmul %6, %7, %cst_6 {dimension_numbers = #tpu.dot_dimension_numbers<[2], [2], [1], [1], [0, 0, 0, 1, 1, 1], [0], [0]>} : vector<2x8x8xf32>, vector<2x8x8xf32>, vector<2x8x8xf32> -> vector<2x8x8xf32>
    "tpu.trace_stop"() : () -> ()
    %cst_7 = arith.constant dense<0xFF800000> : vector<2x8xf32>
    %10 = vector.multi_reduction <maximumf>, %9, %cst_7 [2] : vector<2x8x8xf32> to vector<2x8xf32>
    %11 = vector.shape_cast %10 : vector<2x8xf32> to vector<2x8x1xf32>
    %12 = vector.broadcast %11 : vector<2x8x1xf32> to vector<2x8x8xf32>
    %13 = arith.subf %9, %12 : vector<2x8x8xf32>
    %14 = math.exp %13 : vector<2x8x8xf32>
    %cst_8 = arith.constant dense<0.000000e+00> : vector<2x8xf32>
    %15 = vector.multi_reduction <add>, %14, %cst_8 [2] : vector<2x8x8xf32> to vector<2x8xf32>
    %16 = vector.shape_cast %15 : vector<2x8xf32> to vector<2x8x1xf32>
    %17 = tpu.reciprocal %16 {approx = true} : vector<2x8x1xf32> -> vector<2x8x1xf32>
    %18 = vector.broadcast %17 : vector<2x8x1xf32> to vector<2x8x8xf32>
    %19 = arith.mulf %14, %18 : vector<2x8x8xf32>
    "tpu.trace_start"() <{level = 10 : i32, message = "bqk,bkd->bqd"}> : () -> ()
    %cst_9 = arith.constant dense<0.000000e+00> : vector<2x8x8xf32>
    %20 = tpu.matmul %19, %8, %cst_9 {dimension_numbers = #tpu.dot_dimension_numbers<[2], [1], [1], [2], [0, 0, 0, 1, 1, 2], [0], [0]>} : vector<2x8x8xf32>, vector<2x8x8xf32>, vector<2x8x8xf32> -> vector<2x8x8xf32>
    "tpu.trace_stop"() : () -> ()
    %21 = vector.extract_strided_slice %4 {offsets = [0, 0, 8], sizes = [2, 8, 8], strides = [1, 1, 1]} : vector<2x8x96xf32> to vector<2x8x8xf32>
    %22 = vector.extract_strided_slice %4 {offsets = [0, 0, 40], sizes = [2, 8, 8], strides = [1, 1, 1]} : vector<2x8x96xf32> to vector<2x8x8xf32>
    %23 = vector.extract_strided_slice %4 {offsets = [0, 0, 72], sizes = [2, 8, 8], strides = [1, 1, 1]} : vector<2x8x96xf32> to vector<2x8x8xf32>
    "tpu.trace_start"() <{level = 10 : i32, message = "bqd,bkd->bqk"}> : () -> ()
    %cst_10 = arith.constant dense<0.000000e+00> : vector<2x8x8xf32>
    %24 = tpu.matmul %21, %22, %cst_10 {dimension_numbers = #tpu.dot_dimension_numbers<[2], [2], [1], [1], [0, 0, 0, 1, 1, 1], [0], [0]>} : vector<2x8x8xf32>, vector<2x8x8xf32>, vector<2x8x8xf32> -> vector<2x8x8xf32>
    "tpu.trace_stop"() : () -> ()
    %cst_11 = arith.constant dense<0xFF800000> : vector<2x8xf32>
    %25 = vector.multi_reduction <maximumf>, %24, %cst_11 [2] : vector<2x8x8xf32> to vector<2x8xf32>
    %26 = vector.shape_cast %25 : vector<2x8xf32> to vector<2x8x1xf32>
    %27 = vector.broadcast %26 : vector<2x8x1xf32> to vector<2x8x8xf32>
    %28 = arith.subf %24, %27 : vector<2x8x8xf32>
    %29 = math.exp %28 : vector<2x8x8xf32>
    %cst_12 = arith.constant dense<0.000000e+00> : vector<2x8xf32>
    %30 = vector.multi_reduction <add>, %29, %cst_12 [2] : vector<2x8x8xf32> to vector<2x8xf32>
    %31 = vector.shape_cast %30 : vector<2x8xf32> to vector<2x8x1xf32>
    %32 = tpu.reciprocal %31 {approx = true} : vector<2x8x1xf32> -> vector<2x8x1xf32>
    %33 = vector.broadcast %32 : vector<2x8x1xf32> to vector<2x8x8xf32>
    %34 = arith.mulf %29, %33 : vector<2x8x8xf32>
    "tpu.trace_start"() <{level = 10 : i32, message = "bqk,bkd->bqd"}> : () -> ()
    %cst_13 = arith.constant dense<0.000000e+00> : vector<2x8x8xf32>
    %35 = tpu.matmul %34, %23, %cst_13 {dimension_numbers = #tpu.dot_dimension_numbers<[2], [1], [1], [2], [0, 0, 0, 1, 1, 2], [0], [0]>} : vector<2x8x8xf32>, vector<2x8x8xf32>, vector<2x8x8xf32> -> vector<2x8x8xf32>
    "tpu.trace_stop"() : () -> ()
    %36 = vector.extract_strided_slice %4 {offsets = [0, 0, 16], sizes = [2, 8, 8], strides = [1, 1, 1]} : vector<2x8x96xf32> to vector<2x8x8xf32>
    %37 = vector.extract_strided_slice %4 {offsets = [0, 0, 48], sizes = [2, 8, 8], strides = [1, 1, 1]} : vector<2x8x96xf32> to vector<2x8x8xf32>
    %38 = vector.extract_strided_slice %4 {offsets = [0, 0, 80], sizes = [2, 8, 8], strides = [1, 1, 1]} : vector<2x8x96xf32> to vector<2x8x8xf32>
    "tpu.trace_start"() <{level = 10 : i32, message = "bqd,bkd->bqk"}> : () -> ()
    %cst_14 = arith.constant dense<0.000000e+00> : vector<2x8x8xf32>
    %39 = tpu.matmul %36, %37, %cst_14 {dimension_numbers = #tpu.dot_dimension_numbers<[2], [2], [1], [1], [0, 0, 0, 1, 1, 1], [0], [0]>} : vector<2x8x8xf32>, vector<2x8x8xf32>, vector<2x8x8xf32> -> vector<2x8x8xf32>
    "tpu.trace_stop"() : () -> ()
    %cst_15 = arith.constant dense<0xFF800000> : vector<2x8xf32>
    %40 = vector.multi_reduction <maximumf>, %39, %cst_15 [2] : vector<2x8x8xf32> to vector<2x8xf32>
    %41 = vector.shape_cast %40 : vector<2x8xf32> to vector<2x8x1xf32>
    %42 = vector.broadcast %41 : vector<2x8x1xf32> to vector<2x8x8xf32>
    %43 = arith.subf %39, %42 : vector<2x8x8xf32>
    %44 = math.exp %43 : vector<2x8x8xf32>
    %cst_16 = arith.constant dense<0.000000e+00> : vector<2x8xf32>
    %45 = vector.multi_reduction <add>, %44, %cst_16 [2] : vector<2x8x8xf32> to vector<2x8xf32>
    %46 = vector.shape_cast %45 : vector<2x8xf32> to vector<2x8x1xf32>
    %47 = tpu.reciprocal %46 {approx = true} : vector<2x8x1xf32> -> vector<2x8x1xf32>
    %48 = vector.broadcast %47 : vector<2x8x1xf32> to vector<2x8x8xf32>
    %49 = arith.mulf %44, %48 : vector<2x8x8xf32>
    "tpu.trace_start"() <{level = 10 : i32, message = "bqk,bkd->bqd"}> : () -> ()
    %cst_17 = arith.constant dense<0.000000e+00> : vector<2x8x8xf32>
    %50 = tpu.matmul %49, %38, %cst_17 {dimension_numbers = #tpu.dot_dimension_numbers<[2], [1], [1], [2], [0, 0, 0, 1, 1, 2], [0], [0]>} : vector<2x8x8xf32>, vector<2x8x8xf32>, vector<2x8x8xf32> -> vector<2x8x8xf32>
    "tpu.trace_stop"() : () -> ()
    %51 = vector.extract_strided_slice %4 {offsets = [0, 0, 24], sizes = [2, 8, 8], strides = [1, 1, 1]} : vector<2x8x96xf32> to vector<2x8x8xf32>
    %52 = vector.extract_strided_slice %4 {offsets = [0, 0, 56], sizes = [2, 8, 8], strides = [1, 1, 1]} : vector<2x8x96xf32> to vector<2x8x8xf32>
    %53 = vector.extract_strided_slice %4 {offsets = [0, 0, 88], sizes = [2, 8, 8], strides = [1, 1, 1]} : vector<2x8x96xf32> to vector<2x8x8xf32>
    "tpu.trace_start"() <{level = 10 : i32, message = "bqd,bkd->bqk"}> : () -> ()
    %cst_18 = arith.constant dense<0.000000e+00> : vector<2x8x8xf32>
    %54 = tpu.matmul %51, %52, %cst_18 {dimension_numbers = #tpu.dot_dimension_numbers<[2], [2], [1], [1], [0, 0, 0, 1, 1, 1], [0], [0]>} : vector<2x8x8xf32>, vector<2x8x8xf32>, vector<2x8x8xf32> -> vector<2x8x8xf32>
    "tpu.trace_stop"() : () -> ()
    %cst_19 = arith.constant dense<0xFF800000> : vector<2x8xf32>
    %55 = vector.multi_reduction <maximumf>, %54, %cst_19 [2] : vector<2x8x8xf32> to vector<2x8xf32>
    %56 = vector.shape_cast %55 : vector<2x8xf32> to vector<2x8x1xf32>
    %57 = vector.broadcast %56 : vector<2x8x1xf32> to vector<2x8x8xf32>
    %58 = arith.subf %54, %57 : vector<2x8x8xf32>
    %59 = math.exp %58 : vector<2x8x8xf32>
    %cst_20 = arith.constant dense<0.000000e+00> : vector<2x8xf32>
    %60 = vector.multi_reduction <add>, %59, %cst_20 [2] : vector<2x8x8xf32> to vector<2x8xf32>
    %61 = vector.shape_cast %60 : vector<2x8xf32> to vector<2x8x1xf32>
    %62 = tpu.reciprocal %61 {approx = true} : vector<2x8x1xf32> -> vector<2x8x1xf32>
    %63 = vector.broadcast %62 : vector<2x8x1xf32> to vector<2x8x8xf32>
    %64 = arith.mulf %59, %63 : vector<2x8x8xf32>
    "tpu.trace_start"() <{level = 10 : i32, message = "bqk,bkd->bqd"}> : () -> ()
    %cst_21 = arith.constant dense<0.000000e+00> : vector<2x8x8xf32>
    %65 = tpu.matmul %64, %53, %cst_21 {dimension_numbers = #tpu.dot_dimension_numbers<[2], [1], [1], [2], [0, 0, 0, 1, 1, 2], [0], [0]>} : vector<2x8x8xf32>, vector<2x8x8xf32>, vector<2x8x8xf32> -> vector<2x8x8xf32>
    "tpu.trace_stop"() : () -> ()
    %66 = tpu.concatenate %20, %35, %50, %65 in 2 : vector<2x8x8xf32>, vector<2x8x8xf32>, vector<2x8x8xf32>, vector<2x8x8xf32> -> vector<2x8x32xf32>
    %67 = vector.shape_cast %66 : vector<2x8x32xf32> to vector<16x32xf32>
    %cst_22 = arith.constant dense<0.000000e+00> : vector<16x32xf32>
    %68 = tpu.matmul %67, %5, %cst_22 {dimension_numbers = #tpu.dot_dimension_numbers<[1], [0], [0], [1], [0, 0, 1, 1], [], []>} : vector<16x32xf32>, vector<32x32xf32>, vector<16x32xf32> -> vector<16x32xf32>
    %c0_23 = arith.constant 0 : index
    %c0_24 = arith.constant 0 : index
    %69 = vector.load %arg4[%c0_23, %c0_24] : memref<1x32xf32, #tpu.memory_space<vmem>>, vector<1x32xf32>
    %70 = vector.broadcast %69 : vector<1x32xf32> to vector<16x32xf32>
    %71 = arith.addf %68, %70 : vector<16x32xf32>
    %72 = vector.shape_cast %71 : vector<16x32xf32> to vector<2x1x256xf32>
    %c0_25 = arith.constant 0 : index
    %c0_26 = arith.constant 0 : index
    %c0_27 = arith.constant 0 : index
    %73 = vector.load %arg5[%c0_25, %c0_26, %c0_27] : memref<2x1x256xf32, #tpu.memory_space<vmem>>, vector<2x1x256xf32>
    tpu.vector_store %arg5[%c0_25, %c0_26, %c0_27], %72 {strides = array<i32>} : memref<2x1x256xf32, #tpu.memory_space<vmem>>, vector<2x1x256xf32>,
    return
  }
  func.func @transform_0(%arg0: i32) -> (i32, i32, i32) {
    %c0_i32 = arith.constant 0 : i32
    %c0_i32_0 = arith.constant 0 : i32
    %c0_i32_1 = arith.constant 0 : i32
    return %arg0, %c0_i32, %c0_i32_0 : i32, i32, i32
  }
  func.func @transform_1(%arg0: i32) -> (i32, i32) {
    %c0_i32 = arith.constant 0 : i32
    %c0_i32_0 = arith.constant 0 : i32
    %c0_i32_1 = arith.constant 0 : i32
    return %c0_i32, %c0_i32_0 : i32, i32
  }
  func.func @transform_2(%arg0: i32) -> (i32, i32) {
    %c0_i32 = arith.constant 0 : i32
    %c0_i32_0 = arith.constant 0 : i32
    %c0_i32_1 = arith.constant 0 : i32
    return %c0_i32, %c0_i32_0 : i32, i32
  }
  func.func @transform_3(%arg0: i32) -> (i32, i32) {
    %c0_i32 = arith.constant 0 : i32
    %c0_i32_0 = arith.constant 0 : i32
    %c0_i32_1 = arith.constant 0 : i32
    return %c0_i32, %c0_i32_0 : i32, i32
  }
  func.func @transform_4(%arg0: i32) -> (i32, i32, i32) {
    %c0_i32 = arith.constant 0 : i32
    %c0_i32_0 = arith.constant 0 : i32
    %c0_i32_1 = arith.constant 0 : i32
    return %arg0, %c0_i32, %c0_i32_0 : i32, i32, i32
  }
}

module attributes {stable_mosaic.version = 11 : i64} {
  func.func @_self_attention_kernel(%arg0: i32, %arg1: memref<2x8x32xf32, #tpu.memory_space<vmem>>, %arg2: memref<32x96xf32, #tpu.memory_space<vmem>>, %arg3: memref<32x32xf32, #tpu.memory_space<vmem>>, %arg4: memref<1x32xf32, #tpu.memory_space<vmem>>, %arg5: memref<2x8x32xf32, #tpu.memory_space<vmem>>) attributes {dimension_semantics = [#tpu.dimension_semantics<parallel>], iteration_bounds = array<i64: 1>, scalar_prefetch = 0 : i64, scratch_operands = 0 : i64, tpu.core_type = #tpu.core_type<tc>, window_params = [{transform_indices = @transform_0, window_bounds = array<i64: 2, 8, 32>}, {pipeline_mode = #tpu.pipeline_mode<synchronous>, transform_indices = @transform_1, window_bounds = array<i64: 32, 96>}, {pipeline_mode = #tpu.pipeline_mode<synchronous>, transform_indices = @transform_2, window_bounds = array<i64: 32, 32>}, {pipeline_mode = #tpu.pipeline_mode<synchronous>, transform_indices = @transform_3, window_bounds = array<i64: 1, 32>}, {transform_indices = @transform_4, window_bounds = array<i64: 2, 8, 32>}]} {
    %c0 = arith.constant 0 : index
    %c0_0 = arith.constant 0 : index
    %c0_1 = arith.constant 0 : index
    %0 = vector.load %arg1[%c0, %c0_0, %c0_1] : memref<2x8x32xf32, #tpu.memory_space<vmem>>, vector<2x8x32xf32>
    %1 = vector.shape_cast %0 : vector<2x8x32xf32> to vector<16x32xf32>
    %c0_2 = arith.constant 0 : index
    %c0_3 = arith.constant 0 : index
    %2 = vector.load %arg2[%c0_2, %c0_3] : memref<32x96xf32, #tpu.memory_space<vmem>>, vector<32x96xf32>
    %cst = arith.constant dense<0.000000e+00> : vector<16x96xf32>
    %3 = tpu.matmul %1, %2, %cst {dimension_numbers = #tpu.dot_dimension_numbers<[1], [0], [0], [1], [0, 0, 1, 1], [], []>} : vector<16x32xf32>, vector<32x96xf32>, vector<16x96xf32> -> vector<16x96xf32>
    %4 = vector.shape_cast %3 : vector<16x96xf32> to vector<2x8x96xf32>
    %c0_4 = arith.constant 0 : index
    %c0_5 = arith.constant 0 : index
    %5 = vector.load %arg3[%c0_4, %c0_5] : memref<32x32xf32, #tpu.memory_space<vmem>>, vector<32x32xf32>
    %6 = vector.extract_strided_slice %4 {offsets = [0, 0, 0], sizes = [2, 8, 8], strides = [1, 1, 1]} : vector<2x8x96xf32> to vector<2x8x8xf32>
    %7 = vector.extract_strided_slice %4 {offsets = [0, 0, 32], sizes = [2, 8, 8], strides = [1, 1, 1]} : vector<2x8x96xf32> to vector<2x8x8xf32>
    %8 = vector.extract_strided_slice %4 {offsets = [0, 0, 64], sizes = [2, 8, 8], strides = [1, 1, 1]} : vector<2x8x96xf32> to vector<2x8x8xf32>
    "tpu.trace_start"() <{level = 10 : i32, message = "bqd,bkd->bqk"}> : () -> ()
    %cst_6 = arith.constant dense<0.000000e+00> : vector<2x8x8xf32>
    %9 = tpu.matmul %6, %7, %cst_6 {dimension_numbers = #tpu.dot_dimension_numbers<[2], [2], [1], [1], [0, 0, 0, 1, 1, 1], [0], [0]>} : vector<2x8x8xf32>, vector<2x8x8xf32>, vector<2x8x8xf32> -> vector<2x8x8xf32>
    "tpu.trace_stop"() : () -> ()
    %cst_7 = arith.constant dense<0xFF800000> : vector<2x8xf32>
    %10 = vector.multi_reduction <maximumf>, %9, %cst_7 [2] : vector<2x8x8xf32> to vector<2x8xf32>
    %11 = vector.shape_cast %10 : vector<2x8xf32> to vector<2x8x1xf32>
    %12 = vector.broadcast %11 : vector<2x8x1xf32> to vector<2x8x8xf32>
    %13 = arith.subf %9, %12 : vector<2x8x8xf32>
    %14 = math.exp %13 : vector<2x8x8xf32>
    %cst_8 = arith.constant dense<0.000000e+00> : vector<2x8xf32>
    %15 = vector.multi_reduction <add>, %14, %cst_8 [2] : vector<2x8x8xf32> to vector<2x8xf32>
    %16 = vector.shape_cast %15 : vector<2x8xf32> to vector<2x8x1xf32>
    %17 = tpu.reciprocal %16 {approx = true} : vector<2x8x1xf32> -> vector<2x8x1xf32>
    %18 = vector.broadcast %17 : vector<2x8x1xf32> to vector<2x8x8xf32>
    %19 = arith.mulf %14, %18 : vector<2x8x8xf32>
    "tpu.trace_start"() <{level = 10 : i32, message = "bqk,bkd->bqd"}> : () -> ()
    %cst_9 = arith.constant dense<0.000000e+00> : vector<2x8x8xf32>
    %20 = tpu.matmul %19, %8, %cst_9 {dimension_numbers = #tpu.dot_dimension_numbers<[2], [1], [1], [2], [0, 0, 0, 1, 1, 2], [0], [0]>} : vector<2x8x8xf32>, vector<2x8x8xf32>, vector<2x8x8xf32> -> vector<2x8x8xf32>
    "tpu.trace_stop"() : () -> ()
    %21 = vector.extract_strided_slice %4 {offsets = [0, 0, 8], sizes = [2, 8, 8], strides = [1, 1, 1]} : vector<2x8x96xf32> to vector<2x8x8xf32>
    %22 = vector.extract_strided_slice %4 {offsets = [0, 0, 40], sizes = [2, 8, 8], strides = [1, 1, 1]} : vector<2x8x96xf32> to vector<2x8x8xf32>
    %23 = vector.extract_strided_slice %4 {offsets = [0, 0, 72], sizes = [2, 8, 8], strides = [1, 1, 1]} : vector<2x8x96xf32> to vector<2x8x8xf32>
    "tpu.trace_start"() <{level = 10 : i32, message = "bqd,bkd->bqk"}> : () -> ()
    %cst_10 = arith.constant dense<0.000000e+00> : vector<2x8x8xf32>
    %24 = tpu.matmul %21, %22, %cst_10 {dimension_numbers = #tpu.dot_dimension_numbers<[2], [2], [1], [1], [0, 0, 0, 1, 1, 1], [0], [0]>} : vector<2x8x8xf32>, vector<2x8x8xf32>, vector<2x8x8xf32> -> vector<2x8x8xf32>
    "tpu.trace_stop"() : () -> ()
    %cst_11 = arith.constant dense<0xFF800000> : vector<2x8xf32>
    %25 = vector.multi_reduction <maximumf>, %24, %cst_11 [2] : vector<2x8x8xf32> to vector<2x8xf32>
    %26 = vector.shape_cast %25 : vector<2x8xf32> to vector<2x8x1xf32>
    %27 = vector.broadcast %26 : vector<2x8x1xf32> to vector<2x8x8xf32>
    %28 = arith.subf %24, %27 : vector<2x8x8xf32>
    %29 = math.exp %28 : vector<2x8x8xf32>
    %cst_12 = arith.constant dense<0.000000e+00> : vector<2x8xf32>
    %30 = vector.multi_reduction <add>, %29, %cst_12 [2] : vector<2x8x8xf32> to vector<2x8xf32>
    %31 = vector.shape_cast %30 : vector<2x8xf32> to vector<2x8x1xf32>
    %32 = tpu.reciprocal %31 {approx = true} : vector<2x8x1xf32> -> vector<2x8x1xf32>
    %33 = vector.broadcast %32 : vector<2x8x1xf32> to vector<2x8x8xf32>
    %34 = arith.mulf %29, %33 : vector<2x8x8xf32>
    "tpu.trace_start"() <{level = 10 : i32, message = "bqk,bkd->bqd"}> : () -> ()
    %cst_13 = arith.constant dense<0.000000e+00> : vector<2x8x8xf32>
    %35 = tpu.matmul %34, %23, %cst_13 {dimension_numbers = #tpu.dot_dimension_numbers<[2], [1], [1], [2], [0, 0, 0, 1, 1, 2], [0], [0]>} : vector<2x8x8xf32>, vector<2x8x8xf32>, vector<2x8x8xf32> -> vector<2x8x8xf32>
    "tpu.trace_stop"() : () -> ()
    %36 = vector.extract_strided_slice %4 {offsets = [0, 0, 16], sizes = [2, 8, 8], strides = [1, 1, 1]} : vector<2x8x96xf32> to vector<2x8x8xf32>
    %37 = vector.extract_strided_slice %4 {offsets = [0, 0, 48], sizes = [2, 8, 8], strides = [1, 1, 1]} : vector<2x8x96xf32> to vector<2x8x8xf32>
    %38 = vector.extract_strided_slice %4 {offsets = [0, 0, 80], sizes = [2, 8, 8], strides = [1, 1, 1]} : vector<2x8x96xf32> to vector<2x8x8xf32>
    "tpu.trace_start"() <{level = 10 : i32, message = "bqd,bkd->bqk"}> : () -> ()
    %cst_14 = arith.constant dense<0.000000e+00> : vector<2x8x8xf32>
    %39 = tpu.matmul %36, %37, %cst_14 {dimension_numbers = #tpu.dot_dimension_numbers<[2], [2], [1], [1], [0, 0, 0, 1, 1, 1], [0], [0]>} : vector<2x8x8xf32>, vector<2x8x8xf32>, vector<2x8x8xf32> -> vector<2x8x8xf32>
    "tpu.trace_stop"() : () -> ()
    %cst_15 = arith.constant dense<0xFF800000> : vector<2x8xf32>
    %40 = vector.multi_reduction <maximumf>, %39, %cst_15 [2] : vector<2x8x8xf32> to vector<2x8xf32>
    %41 = vector.shape_cast %40 : vector<2x8xf32> to vector<2x8x1xf32>
    %42 = vector.broadcast %41 : vector<2x8x1xf32> to vector<2x8x8xf32>
    %43 = arith.subf %39, %42 : vector<2x8x8xf32>
    %44 = math.exp %43 : vector<2x8x8xf32>
    %cst_16 = arith.constant dense<0.000000e+00> : vector<2x8xf32>
    %45 = vector.multi_reduction <add>, %44, %cst_16 [2] : vector<2x8x8xf32> to vector<2x8xf32>
    %46 = vector.shape_cast %45 : vector<2x8xf32> to vector<2x8x1xf32>
    %47 = tpu.reciprocal %46 {approx = true} : vector<2x8x1xf32> -> vector<2x8x1xf32>
    %48 = vector.broadcast %47 : vector<2x8x1xf32> to vector<2x8x8xf32>
    %49 = arith.mulf %44, %48 : vector<2x8x8xf32>
    "tpu.trace_start"() <{level = 10 : i32, message = "bqk,bkd->bqd"}> : () -> ()
    %cst_17 = arith.constant dense<0.000000e+00> : vector<2x8x8xf32>
    %50 = tpu.matmul %49, %38, %cst_17 {dimension_numbers = #tpu.dot_dimension_numbers<[2], [1], [1], [2], [0, 0, 0, 1, 1, 2], [0], [0]>} : vector<2x8x8xf32>, vector<2x8x8xf32>, vector<2x8x8xf32> -> vector<2x8x8xf32>
    "tpu.trace_stop"() : () -> ()
    %51 = vector.extract_strided_slice %4 {offsets = [0, 0, 24], sizes = [2, 8, 8], strides = [1, 1, 1]} : vector<2x8x96xf32> to vector<2x8x8xf32>
    %52 = vector.extract_strided_slice %4 {offsets = [0, 0, 56], sizes = [2, 8, 8], strides = [1, 1, 1]} : vector<2x8x96xf32> to vector<2x8x8xf32>
    %53 = vector.extract_strided_slice %4 {offsets = [0, 0, 88], sizes = [2, 8, 8], strides = [1, 1, 1]} : vector<2x8x96xf32> to vector<2x8x8xf32>
    "tpu.trace_start"() <{level = 10 : i32, message = "bqd,bkd->bqk"}> : () -> ()
    %cst_18 = arith.constant dense<0.000000e+00> : vector<2x8x8xf32>
    %54 = tpu.matmul %51, %52, %cst_18 {dimension_numbers = #tpu.dot_dimension_numbers<[2], [2], [1], [1], [0, 0, 0, 1, 1, 1], [0], [0]>} : vector<2x8x8xf32>, vector<2x8x8xf32>, vector<2x8x8xf32> -> vector<2x8x8xf32>
    "tpu.trace_stop"() : () -> ()
    %cst_19 = arith.constant dense<0xFF800000> : vector<2x8xf32>
    %55 = vector.multi_reduction <maximumf>, %54, %cst_19 [2] : vector<2x8x8xf32> to vector<2x8xf32>
    %56 = vector.shape_cast %55 : vector<2x8xf32> to vector<2x8x1xf32>
    %57 = vector.broadcast %56 : vector<2x8x1xf32> to vector<2x8x8xf32>
    %58 = arith.subf %54, %57 : vector<2x8x8xf32>
    %59 = math.exp %58 : vector<2x8x8xf32>
    %cst_20 = arith.constant dense<0.000000e+00> : vector<2x8xf32>
    %60 = vector.multi_reduction <add>, %59, %cst_20 [2] : vector<2x8x8xf32> to vector<2x8xf32>
    %61 = vector.shape_cast %60 : vector<2x8xf32> to vector<2x8x1xf32>
    %62 = tpu.reciprocal %61 {approx = true} : vector<2x8x1xf32> -> vector<2x8x1xf32>
    %63 = vector.broadcast %62 : vector<2x8x1xf32> to vector<2x8x8xf32>
    %64 = arith.mulf %59, %63 : vector<2x8x8xf32>
    "tpu.trace_start"() <{level = 10 : i32, message = "bqk,bkd->bqd"}> : () -> ()
    %cst_21 = arith.constant dense<0.000000e+00> : vector<2x8x8xf32>
    %65 = tpu.matmul %64, %53, %cst_21 {dimension_numbers = #tpu.dot_dimension_numbers<[2], [1], [1], [2], [0, 0, 0, 1, 1, 2], [0], [0]>} : vector<2x8x8xf32>, vector<2x8x8xf32>, vector<2x8x8xf32> -> vector<2x8x8xf32>
    "tpu.trace_stop"() : () -> ()
    %66 = tpu.concatenate %20, %35, %50, %65 in 2 : vector<2x8x8xf32>, vector<2x8x8xf32>, vector<2x8x8xf32>, vector<2x8x8xf32> -> vector<2x8x32xf32>
    %67 = vector.shape_cast %66 : vector<2x8x32xf32> to vector<16x32xf32>
    %cst_22 = arith.constant dense<0.000000e+00> : vector<16x32xf32>
    %68 = tpu.matmul %67, %5, %cst_22 {dimension_numbers = #tpu.dot_dimension_numbers<[1], [0], [0], [1], [0, 0, 1, 1], [], []>} : vector<16x32xf32>, vector<32x32xf32>, vector<16x32xf32> -> vector<16x32xf32>
    %c0_23 = arith.constant 0 : index
    %c0_24 = arith.constant 0 : index
    %69 = vector.load %arg4[%c0_23, %c0_24] : memref<1x32xf32, #tpu.memory_space<vmem>>, vector<1x32xf32>
    %70 = vector.broadcast %69 : vector<1x32xf32> to vector<16x32xf32>
    %71 = arith.addf %68, %70 : vector<16x32xf32>
    %72 = vector.shape_cast %71 : vector<16x32xf32> to vector<2x8x32xf32>
    %c0_25 = arith.constant 0 : index
    %c0_26 = arith.constant 0 : index
    %c0_27 = arith.constant 0 : index
    %73 = vector.load %arg5[%c0_25, %c0_26, %c0_27] : memref<2x8x32xf32, #tpu.memory_space<vmem>>, vector<2x8x32xf32>
    tpu.vector_store %arg5[%c0_25, %c0_26, %c0_27], %72 {strides = array<i32>} : memref<2x8x32xf32, #tpu.memory_space<vmem>>, vector<2x8x32xf32>,
    return
  }
  func.func @transform_0(%arg0: i32) -> (i32, i32, i32) {
    %c0_i32 = arith.constant 0 : i32
    %c0_i32_0 = arith.constant 0 : i32
    %c0_i32_1 = arith.constant 0 : i32
    return %arg0, %c0_i32, %c0_i32_0 : i32, i32, i32
  }
  func.func @transform_1(%arg0: i32) -> (i32, i32) {
    %c0_i32 = arith.constant 0 : i32
    %c0_i32_0 = arith.constant 0 : i32
    %c0_i32_1 = arith.constant 0 : i32
    return %c0_i32, %c0_i32_0 : i32, i32
  }
  func.func @transform_2(%arg0: i32) -> (i32, i32) {
    %c0_i32 = arith.constant 0 : i32
    %c0_i32_0 = arith.constant 0 : i32
    %c0_i32_1 = arith.constant 0 : i32
    return %c0_i32, %c0_i32_0 : i32, i32
  }
  func.func @transform_3(%arg0: i32) -> (i32, i32) {
    %c0_i32 = arith.constant 0 : i32
    %c0_i32_0 = arith.constant 0 : i32
    %c0_i32_1 = arith.constant 0 : i32
    return %c0_i32, %c0_i32_0 : i32, i32
  }
  func.func @transform_4(%arg0: i32) -> (i32, i32, i32) {
    %c0_i32 = arith.constant 0 : i32
    %c0_i32_0 = arith.constant 0 : i32
    %c0_i32_1 = arith.constant 0 : i32
    return %arg0, %c0_i32, %c0_i32_0 : i32, i32, i32
  }
}

module attributes {stable_mosaic.version = 11 : i64} {
  func.func @_self_attention_kernel(%arg0: i32, %arg1: memref<2x8x32xf32, #tpu.memory_space<vmem>>, %arg2: memref<32x96xf32, #tpu.memory_space<vmem>>, %arg3: memref<32x32xf32, #tpu.memory_space<vmem>>, %arg4: memref<1x32xf32, #tpu.memory_space<vmem>>, %arg5: memref<2x8x32xf32, #tpu.memory_space<vmem>>) attributes {dimension_semantics = [#tpu.dimension_semantics<parallel>], iteration_bounds = array<i64: 1>, scalar_prefetch = 0 : i64, scratch_operands = 0 : i64, tpu.core_type = #tpu.core_type<tc>, window_params = [{transform_indices = @transform_0, window_bounds = array<i64: 2, 8, 32>}, {pipeline_mode = #tpu.pipeline_mode<synchronous>, transform_indices = @transform_1, window_bounds = array<i64: 32, 96>}, {pipeline_mode = #tpu.pipeline_mode<synchronous>, transform_indices = @transform_2, window_bounds = array<i64: 32, 32>}, {pipeline_mode = #tpu.pipeline_mode<synchronous>, transform_indices = @transform_3, window_bounds = array<i64: 1, 32>}, {transform_indices = @transform_4, window_bounds = array<i64: 2, 8, 32>}]} {
    %c0 = arith.constant 0 : index
    %c0_0 = arith.constant 0 : index
    %c0_1 = arith.constant 0 : index
    %0 = vector.load %arg1[%c0, %c0_0, %c0_1] : memref<2x8x32xf32, #tpu.memory_space<vmem>>, vector<2x8x32xf32>
    %1 = vector.shape_cast %0 : vector<2x8x32xf32> to vector<16x32xf32>
    %c0_2 = arith.constant 0 : index
    %c0_3 = arith.constant 0 : index
    %2 = vector.load %arg2[%c0_2, %c0_3] : memref<32x96xf32, #tpu.memory_space<vmem>>, vector<32x96xf32>
    %cst = arith.constant dense<0.000000e+00> : vector<16x96xf32>
    %3 = tpu.matmul %1, %2, %cst {dimension_numbers = #tpu.dot_dimension_numbers<[1], [0], [0], [1], [0, 0, 1, 1], [], []>} : vector<16x32xf32>, vector<32x96xf32>, vector<16x96xf32> -> vector<16x96xf32>
    %4 = vector.shape_cast %3 : vector<16x96xf32> to vector<2x8x96xf32>
    %c0_4 = arith.constant 0 : index
    %c0_5 = arith.constant 0 : index
    %5 = vector.load %arg3[%c0_4, %c0_5] : memref<32x32xf32, #tpu.memory_space<vmem>>, vector<32x32xf32>
    %6 = vector.extract_strided_slice %4 {offsets = [0, 0, 0], sizes = [2, 8, 8], strides = [1, 1, 1]} : vector<2x8x96xf32> to vector<2x8x8xf32>
    %7 = vector.extract_strided_slice %4 {offsets = [0, 0, 32], sizes = [2, 8, 8], strides = [1, 1, 1]} : vector<2x8x96xf32> to vector<2x8x8xf32>
    %8 = vector.extract_strided_slice %4 {offsets = [0, 0, 64], sizes = [2, 8, 8], strides = [1, 1, 1]} : vector<2x8x96xf32> to vector<2x8x8xf32>
    "tpu.trace_start"() <{level = 10 : i32, message = "bqd,bkd->bqk"}> : () -> ()
    %cst_6 = arith.constant dense<0.000000e+00> : vector<2x8x8xf32>
    %9 = tpu.matmul %6, %7, %cst_6 {dimension_numbers = #tpu.dot_dimension_numbers<[2], [2], [1], [1], [0, 0, 0, 1, 1, 1], [0], [0]>} : vector<2x8x8xf32>, vector<2x8x8xf32>, vector<2x8x8xf32> -> vector<2x8x8xf32>
    "tpu.trace_stop"() : () -> ()
    %cst_7 = arith.constant dense<0xFF800000> : vector<2x8xf32>
    %10 = vector.multi_reduction <maximumf>, %9, %cst_7 [2] : vector<2x8x8xf32> to vector<2x8xf32>
    %11 = vector.shape_cast %10 : vector<2x8xf32> to vector<2x8x1xf32>
    %12 = vector.broadcast %11 : vector<2x8x1xf32> to vector<2x8x8xf32>
    %13 = arith.subf %9, %12 : vector<2x8x8xf32>
    %14 = math.exp %13 : vector<2x8x8xf32>
    %cst_8 = arith.constant dense<0.000000e+00> : vector<2x8xf32>
    %15 = vector.multi_reduction <add>, %14, %cst_8 [2] : vector<2x8x8xf32> to vector<2x8xf32>
    %16 = vector.shape_cast %15 : vector<2x8xf32> to vector<2x8x1xf32>
    %17 = tpu.reciprocal %16 {approx = true} : vector<2x8x1xf32> -> vector<2x8x1xf32>
    %18 = vector.broadcast %17 : vector<2x8x1xf32> to vector<2x8x8xf32>
    %19 = arith.mulf %14, %18 : vector<2x8x8xf32>
    "tpu.trace_start"() <{level = 10 : i32, message = "bqk,bkd->bqd"}> : () -> ()
    %cst_9 = arith.constant dense<0.000000e+00> : vector<2x8x8xf32>
    %20 = tpu.matmul %19, %8, %cst_9 {dimension_numbers = #tpu.dot_dimension_numbers<[2], [1], [1], [2], [0, 0, 0, 1, 1, 2], [0], [0]>} : vector<2x8x8xf32>, vector<2x8x8xf32>, vector<2x8x8xf32> -> vector<2x8x8xf32>
    "tpu.trace_stop"() : () -> ()
    %21 = vector.shape_cast %20 : vector<2x8x8xf32> to vector<16x8xf32>
    %22 = vector.extract_strided_slice %5 {offsets = [0, 0], sizes = [8, 32], strides = [1, 1]} : vector<32x32xf32> to vector<8x32xf32>
    %cst_10 = arith.constant dense<0.000000e+00> : vector<16x32xf32>
    %23 = tpu.matmul %21, %22, %cst_10 {dimension_numbers = #tpu.dot_dimension_numbers<[1], [0], [0], [1], [0, 0, 1, 1], [], []>} : vector<16x8xf32>, vector<8x32xf32>, vector<16x32xf32> -> vector<16x32xf32>
    %24 = vector.extract_strided_slice %4 {offsets = [0, 0, 8], sizes = [2, 8, 8], strides = [1, 1, 1]} : vector<2x8x96xf32> to vector<2x8x8xf32>
    %25 = vector.extract_strided_slice %4 {offsets = [0, 0, 40], sizes = [2, 8, 8], strides = [1, 1, 1]} : vector<2x8x96xf32> to vector<2x8x8xf32>
    %26 = vector.extract_strided_slice %4 {offsets = [0, 0, 72], sizes = [2, 8, 8], strides = [1, 1, 1]} : vector<2x8x96xf32> to vector<2x8x8xf32>
    "tpu.trace_start"() <{level = 10 : i32, message = "bqd,bkd->bqk"}> : () -> ()
    %cst_11 = arith.constant dense<0.000000e+00> : vector<2x8x8xf32>
    %27 = tpu.matmul %24, %25, %cst_11 {dimension_numbers = #tpu.dot_dimension_numbers<[2], [2], [1], [1], [0, 0, 0, 1, 1, 1], [0], [0]>} : vector<2x8x8xf32>, vector<2x8x8xf32>, vector<2x8x8xf32> -> vector<2x8x8xf32>
    "tpu.trace_stop"() : () -> ()
    %cst_12 = arith.constant dense<0xFF800000> : vector<2x8xf32>
    %28 = vector.multi_reduction <maximumf>, %27, %cst_12 [2] : vector<2x8x8xf32> to vector<2x8xf32>
    %29 = vector.shape_cast %28 : vector<2x8xf32> to vector<2x8x1xf32>
    %30 = vector.broadcast %29 : vector<2x8x1xf32> to vector<2x8x8xf32>
    %31 = arith.subf %27, %30 : vector<2x8x8xf32>
    %32 = math.exp %31 : vector<2x8x8xf32>
    %cst_13 = arith.constant dense<0.000000e+00> : vector<2x8xf32>
    %33 = vector.multi_reduction <add>, %32, %cst_13 [2] : vector<2x8x8xf32> to vector<2x8xf32>
    %34 = vector.shape_cast %33 : vector<2x8xf32> to vector<2x8x1xf32>
    %35 = tpu.reciprocal %34 {approx = true} : vector<2x8x1xf32> -> vector<2x8x1xf32>
    %36 = vector.broadcast %35 : vector<2x8x1xf32> to vector<2x8x8xf32>
    %37 = arith.mulf %32, %36 : vector<2x8x8xf32>
    "tpu.trace_start"() <{level = 10 : i32, message = "bqk,bkd->bqd"}> : () -> ()
    %cst_14 = arith.constant dense<0.000000e+00> : vector<2x8x8xf32>
    %38 = tpu.matmul %37, %26, %cst_14 {dimension_numbers = #tpu.dot_dimension_numbers<[2], [1], [1], [2], [0, 0, 0, 1, 1, 2], [0], [0]>} : vector<2x8x8xf32>, vector<2x8x8xf32>, vector<2x8x8xf32> -> vector<2x8x8xf32>
    "tpu.trace_stop"() : () -> ()
    %39 = vector.shape_cast %38 : vector<2x8x8xf32> to vector<16x8xf32>
    %40 = vector.extract_strided_slice %5 {offsets = [8, 0], sizes = [8, 32], strides = [1, 1]} : vector<32x32xf32> to vector<8x32xf32>
    %cst_15 = arith.constant dense<0.000000e+00> : vector<16x32xf32>
    %41 = tpu.matmul %39, %40, %cst_15 {dimension_numbers = #tpu.dot_dimension_numbers<[1], [0], [0], [1], [0, 0, 1, 1], [], []>} : vector<16x8xf32>, vector<8x32xf32>, vector<16x32xf32> -> vector<16x32xf32>
    %42 = arith.addf %23, %41 : vector<16x32xf32>
    %43 = vector.extract_strided_slice %4 {offsets = [0, 0, 16], sizes = [2, 8, 8], strides = [1, 1, 1]} : vector<2x8x96xf32> to vector<2x8x8xf32>
    %44 = vector.extract_strided_slice %4 {offsets = [0, 0, 48], sizes = [2, 8, 8], strides = [1, 1, 1]} : vector<2x8x96xf32> to vector<2x8x8xf32>
    %45 = vector.extract_strided_slice %4 {offsets = [0, 0, 80], sizes = [2, 8, 8], strides = [1, 1, 1]} : vector<2x8x96xf32> to vector<2x8x8xf32>
    "tpu.trace_start"() <{level = 10 : i32, message = "bqd,bkd->bqk"}> : () -> ()
    %cst_16 = arith.constant dense<0.000000e+00> : vector<2x8x8xf32>
    %46 = tpu.matmul %43, %44, %cst_16 {dimension_numbers = #tpu.dot_dimension_numbers<[2], [2], [1], [1], [0, 0, 0, 1, 1, 1], [0], [0]>} : vector<2x8x8xf32>, vector<2x8x8xf32>, vector<2x8x8xf32> -> vector<2x8x8xf32>
    "tpu.trace_stop"() : () -> ()
    %cst_17 = arith.constant dense<0xFF800000> : vector<2x8xf32>
    %47 = vector.multi_reduction <maximumf>, %46, %cst_17 [2] : vector<2x8x8xf32> to vector<2x8xf32>
    %48 = vector.shape_cast %47 : vector<2x8xf32> to vector<2x8x1xf32>
    %49 = vector.broadcast %48 : vector<2x8x1xf32> to vector<2x8x8xf32>
    %50 = arith.subf %46, %49 : vector<2x8x8xf32>
    %51 = math.exp %50 : vector<2x8x8xf32>
    %cst_18 = arith.constant dense<0.000000e+00> : vector<2x8xf32>
    %52 = vector.multi_reduction <add>, %51, %cst_18 [2] : vector<2x8x8xf32> to vector<2x8xf32>
    %53 = vector.shape_cast %52 : vector<2x8xf32> to vector<2x8x1xf32>
    %54 = tpu.reciprocal %53 {approx = true} : vector<2x8x1xf32> -> vector<2x8x1xf32>
    %55 = vector.broadcast %54 : vector<2x8x1xf32> to vector<2x8x8xf32>
    %56 = arith.mulf %51, %55 : vector<2x8x8xf32>
    "tpu.trace_start"() <{level = 10 : i32, message = "bqk,bkd->bqd"}> : () -> ()
    %cst_19 = arith.constant dense<0.000000e+00> : vector<2x8x8xf32>
    %57 = tpu.matmul %56, %45, %cst_19 {dimension_numbers = #tpu.dot_dimension_numbers<[2], [1], [1], [2], [0, 0, 0, 1, 1, 2], [0], [0]>} : vector<2x8x8xf32>, vector<2x8x8xf32>, vector<2x8x8xf32> -> vector<2x8x8xf32>
    "tpu.trace_stop"() : () -> ()
    %58 = vector.shape_cast %57 : vector<2x8x8xf32> to vector<16x8xf32>
    %59 = vector.extract_strided_slice %5 {offsets = [16, 0], sizes = [8, 32], strides = [1, 1]} : vector<32x32xf32> to vector<8x32xf32>
    %cst_20 = arith.constant dense<0.000000e+00> : vector<16x32xf32>
    %60 = tpu.matmul %58, %59, %cst_20 {dimension_numbers = #tpu.dot_dimension_numbers<[1], [0], [0], [1], [0, 0, 1, 1], [], []>} : vector<16x8xf32>, vector<8x32xf32>, vector<16x32xf32> -> vector<16x32xf32>
    %61 = arith.addf %42, %60 : vector<16x32xf32>
    %62 = vector.extract_strided_slice %4 {offsets = [0, 0, 24], sizes = [2, 8, 8], strides = [1, 1, 1]} : vector<2x8x96xf32> to vector<2x8x8xf32>
    %63 = vector.extract_strided_slice %4 {offsets = [0, 0, 56], sizes = [2, 8, 8], strides = [1, 1, 1]} : vector<2x8x96xf32> to vector<2x8x8xf32>
    %64 = vector.extract_strided_slice %4 {offsets = [0, 0, 88], sizes = [2, 8, 8], strides = [1, 1, 1]} : vector<2x8x96xf32> to vector<2x8x8xf32>
    "tpu.trace_start"() <{level = 10 : i32, message = "bqd,bkd->bqk"}> : () -> ()
    %cst_21 = arith.constant dense<0.000000e+00> : vector<2x8x8xf32>
    %65 = tpu.matmul %62, %63, %cst_21 {dimension_numbers = #tpu.dot_dimension_numbers<[2], [2], [1], [1], [0, 0, 0, 1, 1, 1], [0], [0]>} : vector<2x8x8xf32>, vector<2x8x8xf32>, vector<2x8x8xf32> -> vector<2x8x8xf32>
    "tpu.trace_stop"() : () -> ()
    %cst_22 = arith.constant dense<0xFF800000> : vector<2x8xf32>
    %66 = vector.multi_reduction <maximumf>, %65, %cst_22 [2] : vector<2x8x8xf32> to vector<2x8xf32>
    %67 = vector.shape_cast %66 : vector<2x8xf32> to vector<2x8x1xf32>
    %68 = vector.broadcast %67 : vector<2x8x1xf32> to vector<2x8x8xf32>
    %69 = arith.subf %65, %68 : vector<2x8x8xf32>
    %70 = math.exp %69 : vector<2x8x8xf32>
    %cst_23 = arith.constant dense<0.000000e+00> : vector<2x8xf32>
    %71 = vector.multi_reduction <add>, %70, %cst_23 [2] : vector<2x8x8xf32> to vector<2x8xf32>
    %72 = vector.shape_cast %71 : vector<2x8xf32> to vector<2x8x1xf32>
    %73 = tpu.reciprocal %72 {approx = true} : vector<2x8x1xf32> -> vector<2x8x1xf32>
    %74 = vector.broadcast %73 : vector<2x8x1xf32> to vector<2x8x8xf32>
    %75 = arith.mulf %70, %74 : vector<2x8x8xf32>
    "tpu.trace_start"() <{level = 10 : i32, message = "bqk,bkd->bqd"}> : () -> ()
    %cst_24 = arith.constant dense<0.000000e+00> : vector<2x8x8xf32>
    %76 = tpu.matmul %75, %64, %cst_24 {dimension_numbers = #tpu.dot_dimension_numbers<[2], [1], [1], [2], [0, 0, 0, 1, 1, 2], [0], [0]>} : vector<2x8x8xf32>, vector<2x8x8xf32>, vector<2x8x8xf32> -> vector<2x8x8xf32>
    "tpu.trace_stop"() : () -> ()
    %77 = vector.shape_cast %76 : vector<2x8x8xf32> to vector<16x8xf32>
    %78 = vector.extract_strided_slice %5 {offsets = [24, 0], sizes = [8, 32], strides = [1, 1]} : vector<32x32xf32> to vector<8x32xf32>
    %cst_25 = arith.constant dense<0.000000e+00> : vector<16x32xf32>
    %79 = tpu.matmul %77, %78, %cst_25 {dimension_numbers = #tpu.dot_dimension_numbers<[1], [0], [0], [1], [0, 0, 1, 1], [], []>} : vector<16x8xf32>, vector<8x32xf32>, vector<16x32xf32> -> vector<16x32xf32>
    %80 = arith.addf %61, %79 : vector<16x32xf32>
    %c0_26 = arith.constant 0 : index
    %c0_27 = arith.constant 0 : index
    %81 = vector.load %arg4[%c0_26, %c0_27] : memref<1x32xf32, #tpu.memory_space<vmem>>, vector<1x32xf32>
    %82 = vector.broadcast %81 : vector<1x32xf32> to vector<16x32xf32>
    %83 = arith.addf %80, %82 : vector<16x32xf32>
    %84 = vector.shape_cast %83 : vector<16x32xf32> to vector<2x8x32xf32>
    %c0_28 = arith.constant 0 : index
    %c0_29 = arith.constant 0 : index
    %c0_30 = arith.constant 0 : index
    %85 = vector.load %arg5[%c0_28, %c0_29, %c0_30] : memref<2x8x32xf32, #tpu.memory_space<vmem>>, vector<2x8x32xf32>
    tpu.vector_store %arg5[%c0_28, %c0_29, %c0_30], %84 {strides = array<i32>} : memref<2x8x32xf32, #tpu.memory_space<vmem>>, vector<2x8x32xf32>,
    return
  }
  func.func @transform_0(%arg0: i32) -> (i32, i32, i32) {
    %c0_i32 = arith.constant 0 : i32
    %c0_i32_0 = arith.constant 0 : i32
    %c0_i32_1 = arith.constant 0 : i32
    return %arg0, %c0_i32, %c0_i32_0 : i32, i32, i32
  }
  func.func @transform_1(%arg0: i32) -> (i32, i32) {
    %c0_i32 = arith.constant 0 : i32
    %c0_i32_0 = arith.constant 0 : i32
    %c0_i32_1 = arith.constant 0 : i32
    return %c0_i32, %c0_i32_0 : i32, i32
  }
  func.func @transform_2(%arg0: i32) -> (i32, i32) {
    %c0_i32 = arith.constant 0 : i32
    %c0_i32_0 = arith.constant 0 : i32
    %c0_i32_1 = arith.constant 0 : i32
    return %c0_i32, %c0_i32_0 : i32, i32
  }
  func.func @transform_3(%arg0: i32) -> (i32, i32) {
    %c0_i32 = arith.constant 0 : i32
    %c0_i32_0 = arith.constant 0 : i32
    %c0_i32_1 = arith.constant 0 : i32
    return %c0_i32, %c0_i32_0 : i32, i32
  }
  func.func @transform_4(%arg0: i32) -> (i32, i32, i32) {
    %c0_i32 = arith.constant 0 : i32
    %c0_i32_0 = arith.constant 0 : i32
    %c0_i32_1 = arith.constant 0 : i32
    return %arg0, %c0_i32, %c0_i32_0 : i32, i32, i32
  }
}

</mosaic_0001>

<bundles_post_ra>
// kernel: tpu_custom_call.1
= control target key start
LH: loop header
LB: loop body
LE: loop exit
PB: predicated region body
PF: predicated region fallthrough
CT: control target
= control target key end

     0   :  { %9 = vsyncpa [#allocation3], 0  ;;  %s2202_s0 = inlined_call_operand.hbm [shape: f32[2,8,32], index: 0, kind: input, shape index: {}]   ;;  %s2203_s1 = inlined_call_operand.hbm [shape: f32[32,96], index: 1, kind: input, shape index: {}]   ;;  %s2204_s2 = inlined_call_operand.hbm [shape: f32[32,32], index: 2, kind: input, shape index: {}]   ;;  %s2205_s3 = inlined_call_operand.vmem [shape: f32[1,32], index: 3, kind: input, shape index: {}]   ;;  %s2206_s4 = inlined_call_operand.hbm [shape: f32[2,8,32], index: 4, kind: output, shape index: {}]  }
   0x1   :  { %10 = vsyncpa [#allocation6], 0 }
   0x2   :  { %11 = vsyncpa [#allocation4], 0  ;;  %s1948_s15 = smov [#allocation5]   ;;  %s1949_s17 = smov [#allocation2]  }
   0x3   :  { %s29_s16 = sshll.u32 %s1948_s15, 4  ;;  %s17_s18 = sshll.u32 %s1949_s17, 4  ;;  %s30_s16 = int_to_ptr.vmem [resolvable:$true] %s29_s16  ;;  %s1994_s18 = int_to_ptr.vmem [resolvable:$true] %s17_s18 }
   0x4   :  { %s1854_s21 = scalar_lea.hbm %s2203_s1, 512 }
   0x5   :  { %p1855_p0 = scmp.ne.s32.totalorder %s2203_s1, %s1854_s21  ;;  %p1858_p1 = scmp.lt.u32.totalorder %s1854_s21, %s2203_s1 }
   0x7   :  { %p1860_p2 = pnand %p1858_p1, %p1855_p0 }
   0x9   :  { %1863 = shalt.err (!%p1860_p2)
}
   0xa   :  { %s1864_s26 = scalar_lea.vmem %s30_s16, 512  ;;  %p1869_p4 = scmp.lt.s32.totalorder %s30_s16, %s30_s16 }
   0xb   :  { %p1865_p3 = scmp.ne.s32.totalorder %s30_s16, %s1864_s26  ;;  %p1870_p5 = scmp.lt.s32.totalorder %s1864_s26, %s1864_s26 }
   0xd   :  { %p1871_p6 = por %p1870_p5, %p1869_p4 }
   0xf   :  { %p1872_p7 = pnand %p1871_p6, %p1865_p3 }
  0x11   :  { %1875 = shalt.err (!%p1872_p7)
}
  0x12   :  { %s1950_s27 = smov 128   ;;  %s1951_s28 = smov 8  }
  0x13   :  { %35 = dma.hbm_to_vmem [thread:$0]  %s2203_s1, 512, %s30_s16, [#allocation6], %s1950_s27, %s1950_s27, %s1951_s28  }
  0x14   :  { %s1876_s7 = scalar_lea.hbm %s2202_s0, 256 }
  0x15   :  { %p1877_p8 = scmp.ne.s32.totalorder %s2202_s0, %s1876_s7  ;;  %p1880_p9 = scmp.lt.u32.totalorder %s1876_s7, %s2202_s0 }
  0x17   :  { %p1882_p10 = pnand %p1880_p9, %p1877_p8 }
  0x19   :  { %1885 = shalt.err (!%p1882_p10)
}
  0x1a   :  { %s1886_s12 = scalar_lea.vmem %s1994_s18, 256  ;;  %p1891_p12 = scmp.lt.s32.totalorder %s1994_s18, %s1994_s18 }
  0x1b   :  { %p1887_p11 = scmp.ne.s32.totalorder %s1994_s18, %s1886_s12  ;;  %p1892_p13 = scmp.lt.s32.totalorder %s1886_s12, %s1886_s12 }
  0x1d   :  { %p1893_p0 = por %p1892_p13, %p1891_p12 }
  0x1f   :  { %p1894_p1 = pnand %p1893_p0, %p1887_p11 }
  0x21   :  { %1897 = shalt.err (!%p1894_p1)
}
  0x22   :  { %23 = dma.hbm_to_vmem [thread:$0]  %s2202_s0, 256, %s1994_s18, [#allocation3], %s1950_s27, %s1950_s27, %s1951_s28  }
  0x23   :  { %s1952_s14 = smov [#allocation7]   ;;  %s1898_s19 = scalar_lea.hbm %s2204_s2, 512 }
  0x24   :  { %s41_s15 = sshll.u32 %s1952_s14, 4  ;;  %p1899_p2 = scmp.ne.s32.totalorder %s2204_s2, %s1898_s19  ;;  %s42_s15 = int_to_ptr.vmem [resolvable:$true] %s41_s15 }
  0x25   :  { %p1902_p3 = scmp.lt.u32.totalorder %s1898_s19, %s2204_s2 }
  0x27   :  { %p1904_p4 = pnand %p1902_p3, %p1899_p2 }
  0x29   :  { %1907 = shalt.err (!%p1904_p4)
}
  0x2a   :  { %s1908_s24 = scalar_lea.vmem %s42_s15, 512  ;;  %p1913_p6 = scmp.lt.s32.totalorder %s42_s15, %s42_s15 }
  0x2b   :  { %p1909_p5 = scmp.ne.s32.totalorder %s42_s15, %s1908_s24  ;;  %p1914_p7 = scmp.lt.s32.totalorder %s1908_s24, %s1908_s24 }
  0x2d   :  { %p1915_p8 = por %p1914_p7, %p1913_p6 }
  0x2f   :  { %p1916_p9 = pnand %p1915_p8, %p1909_p5 }
  0x31   :  { %1919 = shalt.err (!%p1916_p9)
}
  0x32   :  { %47 = dma.hbm_to_vmem [thread:$0]  %s2204_s2, 512, %s42_s15, [#allocation6], %s1950_s27, %s1950_s27, %s1951_s28  }
  0x33   :  { %1942 = dma.done.wait [#allocation3], 256  }
  0x34   :  { %1943 = vsyncadd [#allocation3], 4294967040 }
  0x35   :  { %1944 = dma.done.wait [#allocation6], 1024  }
  0x36   :  { %1945 = vsyncadd [#allocation6], 4294966272  ;;  %vm65_vm0 = vcmask 261120   ;;  %v61_v0 = vld [vmem:[#allocation5] sm:$0xff]  ;;  %v62_v1 = vld [vmem:[#allocation5 + $0x8] sm:$0xff]  ;;  %v1953_v8 = vmov 0.0  }
  0x37   :  { %v63_v2 = vld [vmem:[#allocation5 + $0x10] sm:$0xff]  ;;  %v1785_v3 = vpack.c.bf16 %v62_v1, %v61_v0  ;;  %v64_v4 = vld [vmem:[#allocation5 + $0x18] sm:$0xff]  ;;  %1694 = vmatprep.subr.mxu1 %v1953_v8  ;;  %vm1954_vm1 = vmmov 0   ;;  %s1955_s2 = smov 96   ;;  %vm154_vm2 = vcmask 64512   ;;  %s1956_s25 = smov 64  }
  0x38   :  { %v59_v5 = vld [vmem:[#allocation2] sm:$0xff]  ;;  %v1789_v6 = vpack.c.bf16 %v64_v4, %v63_v2  ;;  %v60_v7 = vld [vmem:[#allocation2 + $0x8] sm:$0xff]  ;;  %1696 = vmatprep.mubr.msk.f32.mxu1 %vm1954_vm1, %v1953_v8  ;;  %s1957_s26 = smov 88   ;;  %s1958_s29 = smov 120   ;;  %vm1499_vm3 = vcmask 195584   ;;  %vm1496_vm4 = vcmask 130048  }
  0x39   :  { %1691 = vmatprep.mubr.msk.f32.mxu0 %vm65_vm0, %v59_v5  ;;  %1786 = vmatprep.subr.bf16.mxu0 %v1785_v3  ;;  %s1959_s30 = smov 56   ;;  %s1960_s5 = smov 112  }
  0x3a   :  { %1788 = vmatpush3.bf16.msra.mxu0 %v1785_v3  ;;  %s1961_s6 = smov 80   ;;  %s1962_s7 = smov 48  }
  0x3b   :  { %1790 = vmatprep.subr.bf16.mxu0 %v1789_v6  ;;  %s1963_s8 = smov 72   ;;  %s1964_s9 = smov 104  }
  0x3c   :  { %s1965_s10 = smov 40   ;;  %s1966_s11 = smov 16  }
  0x3d   :  { %s1967_s12 = smov 24   ;;  %s1968_s14 = smov [#allocation8]  }
  0x3e   :  { %1792 = vmatpush3.bf16.msra.mxu0 %v1789_v6  ;;  %s1597_s15 = sshll.u32 %s1968_s14, 4  ;;  %s1598_s15 = int_to_ptr.vmem [resolvable:$true] %s1597_s15 }
  0x3f   :  { %1714 = vmatprep.subr.mxu0 %v1953_v8  ;;  %s1920_s16 = scalar_lea.vmem %s1598_s15, 256  ;;  %p1925_p11 = scmp.lt.s32.totalorder %s1598_s15, %s1598_s15 }
  0x40   :  { %p1921_p10 = scmp.ne.s32.totalorder %s1598_s15, %s1920_s16  ;;  %p1926_p12 = scmp.lt.s32.totalorder %s1920_s16, %s1920_s16 }
  0x41   :  { %1692 = vmatmul.mubr.msk.f32.vlgmr.msra.gmra.mrb[0].mxu0 %vm65_vm0, %v60_v7 }
  0x42   :  { %1716 = vmatprep.mubr.msk.f32.mxu0 %vm1954_vm1, %v1953_v8  ;;  %p1927_p13 = por %p1926_p12, %p1925_p11 }
  0x44   :  { %p1928_p0 = pnand %p1927_p13, %p1921_p10 }
 0x114   :  { %v2054_v9 = vpop.f32.mrb[0].mxu0 }
 0x115   :  { %v2056_v10 = vpop.f32.mrb[1].mxu0 }
 0x116   :  { %152 = vrot.lane.b32.xlu0 %v2056_v10, %s1955_s2 }
 0x11a   :  { %230 = vrot.lane.b32.xlu0 %v2054_v9, %s1955_s2 }
 0x188   :  { %v153_v11 = vpop.permute.xlu0 %152 }
 0x189   :  { %1695 = vmatpush3.xpose.msk.msra.mxu1 %vm154_vm2, %v153_v11 }
 0x18a   :  { %1699 = vmatprep.subr.mxu1 %v1953_v8 }
 0x18c   :  { %1697 = vmatmul.mubr.msk.f32.vlgmr.msra.gmra.mrb[0].mxu1 %vm154_vm2, %v2056_v10  ;;  %v231_v12 = vpop.permute.xlu0 %230 }
 0x18d   :  { %1700 = vmatpush3.xpose.msk.msra.mxu1 %vm154_vm2, %v231_v12  ;;  %1701 = vmatprep.mubr.msk.f32.mxu1 %vm1954_vm1, %v1953_v8 }
 0x18e   :  { %1704 = vmatprep.subr.mxu1 %v1953_v8 }
 0x190   :  { %1702 = vmatmul.mubr.msk.f32.vlgmr.msra.gmra.mrb[2].mxu1 %vm154_vm2, %v2054_v9 }
 0x191   :  { %1706 = vmatprep.mubr.msk.f32.mxu1 %vm1954_vm1, %v1953_v8 }
 0x25f   :  { %v225_v13 = vpop.f32.mrb[0].mxu1 }
 0x260   :  { %v1698_v14 = vpop.f32.mrb[1].mxu1  ;;  %v306_v15 = vsel %vm154_vm2, %v225_v13, -inf }
 0x261   :  { %307 = vmax.xlane.f32.xlu1 %v306_v15 }
 0x263   :  { %v302_v16 = vpop.f32.mrb[2].mxu1 }
 0x264   :  { %v1703_v17 = vpop.f32.mrb[3].mxu1  ;;  %v309_v18 = vsel %vm154_vm2, %v302_v16, -inf }
 0x265   :  { %310 = vmax.xlane.f32.xlu1 %v309_v18 }
 0x276   :  { %328 = vrot.lane.b32.xlu1 %v2056_v10, %s1956_s25 }
 0x27a   :  { %404 = vrot.lane.b32.xlu1 %v2054_v9, %s1956_s25 }
 0x27e   :  { %482 = vrot.lane.b32.xlu1 %v2056_v10, %s1957_s26 }
 0x282   :  { %560 = vrot.lane.b32.xlu1 %v2054_v9, %s1957_s26 }
 0x2ee   :  { %v308_v19 = vpop.xlane.xlu1 %307 }
 0x2ef   :  { %v312_v20 = vsub.f32 %v225_v13, %v308_v19 }
 0x2f1   :  { %v314_v21 = vmul.f32 1.442695, %v312_v20 }
 0x2f2   :  { %v311_v22 = vpop.xlane.xlu1 %310 }
 0x2f3   :  { %1822 = vpow2.f32 %v314_v21  ;;  %v313_v23 = vsub.f32 %v302_v16, %v311_v22 }
 0x2f5   :  { %v316_v24 = vmul.f32 1.442695, %v313_v23 }
 0x2f6   :  { %v329_v25 = vpop.permute.xlu1 %328 }
 0x2f7   :  { %1824 = vpow2.f32 %v316_v24  ;;  %1705 = vmatpush3.msra.mxu1 %v329_v25 }
 0x2f8   :  { %1709 = vmatprep.subr.mxu1 %v1953_v8 }
 0x2fa   :  { %v405_v26 = vpop.permute.xlu1 %404 }
 0x2fd   :  { %v1823_v27 = vpop.eup %1822 }
 0x2fe   :  { %v483_v28 = vpop.permute.xlu1 %482  ;;  %v318_v29 = vsel %vm154_vm2, %v1823_v27, 0.0 }
 0x2ff   :  { %319 = vadd.xlane.f32.xlu0 %v318_v29  ;;  %1715 = vmatpush3.xpose.msk.msra.mxu0 %vm154_vm2, %v483_v28 }
 0x300   :  { %1724 = vmatprep.subr.mxu0 %v1953_v8 }
 0x301   :  { %v1825_v30 = vpop.eup %1824 }
 0x302   :  { %v321_v31 = vsel %vm154_vm2, %v1825_v30, 0.0  ;;  %v561_v32 = vpop.permute.xlu1 %560 }
 0x303   :  { %322 = vadd.xlane.f32.xlu1 %v321_v31 }
 0x314   :  { %558 = vrot.lane.b32.xlu1 %v2054_v9, %s1958_s29 }
 0x315   :  { %480 = vrot.lane.b32.xlu0 %v2056_v10, %s1958_s29 }
 0x38c   :  { %v320_v33 = vpop.xlane.xlu0 %319 }
 0x38d   :  { %1826 = vrcp.f32 %v320_v33 }
 0x390   :  { %v323_v34 = vpop.xlane.xlu1 %322  ;;  %v481_v35 = vpop.permute.xlu0 %480 }
 0x391   :  { %1828 = vrcp.f32 %v323_v34  ;;  %1717 = vmatmul.mubr.msk.f32.vlgmr.msra.gmra.mrb[2].mxu0 %vm154_vm2, %v481_v35 }
 0x392   :  { %1726 = vmatprep.mubr.msk.f32.mxu0 %vm1954_vm1, %v1953_v8 }
 0x394   :  { %v559_v40 = vpop.permute.xlu1 %558 }
 0x397   :  { %v1827_v36 = vpop.eup %1826 }
 0x398   :  { %v326_v37 = vmul.f32 %v1827_v36, %v1823_v27 }
 0x39a   :  { %1707 = vmatmul.mubr.msk.f32.vlgmr.msra.gmra.mrb[4].mxu1 %vm154_vm2, %v326_v37 }
 0x39b   :  { %v1829_v38 = vpop.eup %1828  ;;  %1710 = vmatpush3.msra.mxu1 %v405_v26  ;;  %1711 = vmatprep.mubr.msk.f32.mxu1 %vm1954_vm1, %v1953_v8 }
 0x39c   :  { %v327_v39 = vmul.f32 %v1829_v38, %v1825_v30  ;;  %1719 = vmatprep.subr.mxu1 %v1953_v8 }
 0x39e   :  { %1712 = vmatmul.mubr.msk.f32.vlgmr.msra.gmra.mrb[6].mxu1 %vm154_vm2, %v327_v39 }
 0x39f   :  { %1721 = vmatprep.mubr.msk.f32.mxu1 %vm1954_vm1, %v1953_v8 }
 0x3a2   :  { %1720 = vmatpush3.xpose.msk.msra.mxu1 %vm154_vm2, %v561_v32 }
 0x3a3   :  { %1729 = vmatprep.subr.mxu1 %v1953_v8 }
 0x3a5   :  { %1722 = vmatmul.mubr.msk.f32.vlgmr.msra.gmra.mrb[8].mxu1 %vm154_vm2, %v559_v40 }
 0x3a6   :  { %1731 = vmatprep.mubr.msk.f32.mxu1 %vm1954_vm1, %v1953_v8 }
 0x464   :  { %v554_v41 = vpop.f32.mrb[2].mxu0 }
 0x465   :  { %v1718_v42 = vpop.f32.mrb[3].mxu0  ;;  %v636_v43 = vsel %vm154_vm2, %v554_v41, -inf }
 0x466   :  { %637 = vmax.xlane.f32.xlu1 %v636_v43 }
 0x46d   :  { %v2101_v44 = vpop.f32.mrb[4].mxu1 }
 0x46e   :  { %v1708_v45 = vpop.f32.mrb[5].mxu1 }
 0x471   :  { %v2103_v46 = vpop.f32.mrb[6].mxu1 }
 0x472   :  { %v1713_v47 = vpop.f32.mrb[7].mxu1 }
 0x478   :  { %v632_v48 = vpop.f32.mrb[8].mxu1 }
 0x479   :  { %v1723_v49 = vpop.f32.mrb[9].mxu1  ;;  %v639_v50 = vsel %vm154_vm2, %v632_v48, -inf }
 0x47a   :  { %640 = vmax.xlane.f32.xlu0 %v639_v50 }
 0x490   :  { %734 = vrot.lane.b32.xlu0 %v2054_v9, %s1959_s30 }
 0x494   :  { %810 = vrot.lane.b32.xlu0 %v2056_v10, %s1960_s5 }
 0x4f3   :  { %v638_v51 = vpop.xlane.xlu1 %637 }
 0x4f4   :  { %v642_v52 = vsub.f32 %v554_v41, %v638_v51 }
 0x4f6   :  { %v644_v53 = vmul.f32 1.442695, %v642_v52 }
 0x4f8   :  { %1830 = vpow2.f32 %v644_v53 }
 0x502   :  { %v1831_v54 = vpop.eup %1830 }
 0x503   :  { %v648_v55 = vsel %vm154_vm2, %v1831_v54, 0.0 }
 0x504   :  { %649 = vadd.xlane.f32.xlu1 %v648_v55 }
 0x507   :  { %v641_v56 = vpop.xlane.xlu0 %640 }
 0x508   :  { %v643_v58 = vsub.f32 %v632_v48, %v641_v56 }
 0x50a   :  { %v646_v59 = vmul.f32 1.442695, %v643_v58 }
 0x50b   :  { %v735_v57 = vpop.permute.xlu0 %734 }
 0x50c   :  { %1730 = vmatpush3.msra.mxu1 %v735_v57  ;;  %1832 = vpow2.f32 %v646_v59 }
 0x50d   :  { %1739 = vmatprep.subr.mxu1 %v1953_v8 }
 0x50f   :  { %v811_v3 = vpop.permute.xlu0 %810 }
 0x515   :  { %658 = vrot.lane.b32.xlu1 %v2056_v10, %s1959_s30 }
 0x516   :  { %v1833_v60 = vpop.eup %1832 }
 0x517   :  { %v651_v61 = vsel %vm154_vm2, %v1833_v60, 0.0 }
 0x519   :  { %812 = vrot.lane.b32.xlu1 %v2056_v10, %s1961_s6 }
 0x51d   :  { %890 = vrot.lane.b32.xlu1 %v2054_v9, %s1961_s6 }
 0x541   :  { %652 = vadd.xlane.f32.xlu1 %v651_v61 }
 0x552   :  { %888 = vrot.lane.b32.xlu1 %v2054_v9, %s1960_s5 }
 0x591   :  { %v650_v62 = vpop.xlane.xlu1 %649 }
 0x592   :  { %1834 = vrcp.f32 %v650_v62 }
 0x595   :  { %v659_v63 = vpop.permute.xlu1 %658 }
 0x596   :  { %1725 = vmatpush3.msra.mxu0 %v659_v63 }
 0x597   :  { %1734 = vmatprep.subr.mxu0 %v1953_v8 }
 0x599   :  { %v813_v2 = vpop.permute.xlu1 %812 }
 0x59c   :  { %v1835_v0 = vpop.eup %1834 }
 0x59d   :  { %v656_v1 = vmul.f32 %v1835_v0, %v1831_v54  ;;  %v891_v4 = vpop.permute.xlu1 %890 }
 0x59f   :  { %1727 = vmatmul.mubr.msk.f32.vlgmr.msra.gmra.mrb[4].mxu0 %vm154_vm2, %v656_v1 }
 0x5a0   :  { %1735 = vmatpush3.xpose.msk.msra.mxu0 %vm154_vm2, %v813_v2  ;;  %1736 = vmatprep.mubr.msk.f32.mxu0 %vm1954_vm1, %v1953_v8 }
 0x5a1   :  { %1744 = vmatprep.subr.mxu0 %v1953_v8 }
 0x5a3   :  { %1737 = vmatmul.mubr.msk.f32.vlgmr.msra.gmra.mrb[6].mxu0 %vm154_vm2, %v811_v3 }
 0x5a4   :  { %1746 = vmatprep.mubr.msk.f32.mxu0 %vm1954_vm1, %v1953_v8 }
 0x5ce   :  { %v653_v5 = vpop.xlane.xlu1 %652 }
 0x5cf   :  { %1836 = vrcp.f32 %v653_v5 }
 0x5d2   :  { %v889_v11 = vpop.permute.xlu1 %888 }
 0x5d9   :  { %v1837_v6 = vpop.eup %1836 }
 0x5da   :  { %v657_v7 = vmul.f32 %v1837_v6, %v1833_v60 }
 0x5dc   :  { %1732 = vmatmul.mubr.msk.f32.vlgmr.msra.gmra.mrb[10].mxu1 %vm154_vm2, %v657_v7 }
 0x5dd   :  { %1740 = vmatpush3.xpose.msk.msra.mxu1 %vm154_vm2, %v891_v4  ;;  %1741 = vmatprep.mubr.msk.f32.mxu1 %vm1954_vm1, %v1953_v8 }
 0x5de   :  { %1749 = vmatprep.subr.mxu1 %v1953_v8 }
 0x5e0   :  { %1742 = vmatmul.mubr.msk.f32.vlgmr.msra.gmra.mrb[12].mxu1 %vm154_vm2, %v889_v11  ;;  %v147_v11 = vld [vmem:[#allocation7] sm:$0xff] }
 0x5e1   :  { %1751 = vmatprep.mubr.msk.f32.mxu1 %vm1954_vm1, %v1953_v8 }
 0x672   :  { %v2132_v12 = vpop.f32.mrb[4].mxu0 }
 0x673   :  { %v1728_v13 = vpop.f32.mrb[5].mxu0 }
 0x674   :  { %v149_v13 = vld [vmem:[#allocation7 + $0x10] sm:$0xff] }
 0x676   :  { %v884_v14 = vpop.f32.mrb[6].mxu0 }
 0x677   :  { %v1738_v15 = vpop.f32.mrb[7].mxu0  ;;  %v966_v16 = vsel %vm154_vm2, %v884_v14, -inf }
 0x678   :  { %967 = vmax.xlane.f32.xlu0 %v966_v16 }
 0x6af   :  { %v2135_v17 = vpop.f32.mrb[10].mxu1 }
 0x6b0   :  { %v1733_v18 = vpop.f32.mrb[11].mxu1 }
 0x6b3   :  { %v962_v19 = vpop.f32.mrb[12].mxu1 }
 0x6b4   :  { %v1743_v20 = vpop.f32.mrb[13].mxu1  ;;  %v969_v21 = vsel %vm154_vm2, %v962_v19, -inf }
 0x6b5   :  { %970 = vmax.xlane.f32.xlu1 %v969_v21 }
 0x6c6   :  { %988 = vrot.lane.b32.xlu1 %v2056_v10, %s1962_s7 }
 0x6ca   :  { %1142 = vrot.lane.b32.xlu1 %v2056_v10, %s1963_s8 }
 0x6ce   :  { %1220 = vrot.lane.b32.xlu1 %v2054_v9, %s1963_s8 }
 0x6d2   :  { %1218 = vrot.lane.b32.xlu1 %v2054_v9, %s1964_s9 }
 0x705   :  { %v968_v22 = vpop.xlane.xlu0 %967 }
 0x706   :  { %v972_v23 = vsub.f32 %v884_v14, %v968_v22 }
 0x708   :  { %v974_v24 = vmul.f32 1.442695, %v972_v23 }
 0x70a   :  { %1838 = vpow2.f32 %v974_v24 }
 0x714   :  { %v1839_v25 = vpop.eup %1838 }
 0x715   :  { %v978_v26 = vsel %vm154_vm2, %v1839_v25, 0.0 }
 0x716   :  { %979 = vadd.xlane.f32.xlu0 %v978_v26 }
 0x72c   :  { %1064 = vrot.lane.b32.xlu0 %v2054_v9, %s1962_s7 }
 0x742   :  { %v971_v27 = vpop.xlane.xlu1 %970 }
 0x743   :  { %v973_v28 = vsub.f32 %v962_v19, %v971_v27 }
 0x745   :  { %v976_v29 = vmul.f32 1.442695, %v973_v28 }
 0x746   :  { %v989_v30 = vpop.permute.xlu1 %988 }
 0x747   :  { %1840 = vpow2.f32 %v976_v29  ;;  %1745 = vmatpush3.msra.mxu0 %v989_v30 }
 0x748   :  { %1754 = vmatprep.subr.mxu0 %v1953_v8 }
 0x74a   :  { %v1143_v37 = vpop.permute.xlu1 %1142 }
 0x74e   :  { %v1221_v41 = vpop.permute.xlu1 %1220 }
 0x751   :  { %v1841_v31 = vpop.eup %1840 }
 0x752   :  { %v981_v32 = vsel %vm154_vm2, %v1841_v31, 0.0  ;;  %v1219_v43 = vpop.permute.xlu1 %1218 }
 0x753   :  { %982 = vadd.xlane.f32.xlu0 %v981_v32 }
 0x769   :  { %1140 = vrot.lane.b32.xlu0 %v2056_v10, %s1964_s9 }
 0x7a3   :  { %v980_v33 = vpop.xlane.xlu0 %979 }
 0x7a4   :  { %1842 = vrcp.f32 %v980_v33 }
 0x7a7   :  { %v1065_v34 = vpop.permute.xlu0 %1064 }
 0x7a8   :  { %1750 = vmatpush3.msra.mxu1 %v1065_v34 }
 0x7a9   :  { %1759 = vmatprep.subr.mxu1 %v1953_v8 }
 0x7ae   :  { %v1843_v35 = vpop.eup %1842 }
 0x7af   :  { %v986_v36 = vmul.f32 %v1843_v35, %v1839_v25 }
 0x7b1   :  { %1747 = vmatmul.mubr.msk.f32.vlgmr.msra.gmra.mrb[8].mxu0 %vm154_vm2, %v986_v36 }
 0x7b2   :  { %1755 = vmatpush3.xpose.msk.msra.mxu0 %vm154_vm2, %v1143_v37  ;;  %1756 = vmatprep.mubr.msk.f32.mxu0 %vm1954_vm1, %v1953_v8 }
 0x7b3   :  { %1764 = vmatprep.subr.mxu0 %v1953_v8 }
 0x7e0   :  { %v983_v38 = vpop.xlane.xlu0 %982 }
 0x7e1   :  { %1844 = vrcp.f32 %v983_v38 }
 0x7e4   :  { %v1141_v39 = vpop.permute.xlu0 %1140 }
 0x7e5   :  { %1757 = vmatmul.mubr.msk.f32.vlgmr.msra.gmra.mrb[10].mxu0 %vm154_vm2, %v1141_v39 }
 0x7e6   :  { %1766 = vmatprep.mubr.msk.f32.mxu0 %vm1954_vm1, %v1953_v8 }
 0x7eb   :  { %v1845_v40 = vpop.eup %1844 }
 0x7ec   :  { %v987_v42 = vmul.f32 %v1845_v40, %v1841_v31 }
 0x7ee   :  { %1752 = vmatmul.mubr.msk.f32.vlgmr.msra.gmra.mrb[14].mxu1 %vm154_vm2, %v987_v42 }
 0x7ef   :  { %1760 = vmatpush3.xpose.msk.msra.mxu1 %vm154_vm2, %v1221_v41  ;;  %1761 = vmatprep.mubr.msk.f32.mxu1 %vm1954_vm1, %v1953_v8 }
 0x7f0   :  { %1769 = vmatprep.subr.mxu1 %v1953_v8 }
 0x7f2   :  { %1762 = vmatmul.mubr.msk.f32.vlgmr.msra.gmra.mrb[16].mxu1 %vm154_vm2, %v1219_v43 }
 0x7f3   :  { %1771 = vmatprep.mubr.msk.f32.mxu1 %vm1954_vm1, %v1953_v8 }
 0x884   :  { %v1060_v45 = vpop.f32.mrb[8].mxu0 }
 0x885   :  { %v1748_v47 = vpop.f32.mrb[9].mxu0 }
 0x8b8   :  { %v1214_v48 = vpop.f32.mrb[10].mxu0 }
 0x8b9   :  { %v1758_v49 = vpop.f32.mrb[11].mxu0  ;;  %v1296_v50 = vsel %vm154_vm2, %v1214_v48, -inf }
 0x8ba   :  { %1297 = vmax.xlane.f32.xlu0 %v1296_v50 }
 0x8c1   :  { %v1136_v51 = vpop.f32.mrb[14].mxu1 }
 0x8c2   :  { %v1753_v52 = vpop.f32.mrb[15].mxu1 }
 0x8c5   :  { %v1292_v53 = vpop.f32.mrb[16].mxu1 }
 0x8c6   :  { %v1763_v54 = vpop.f32.mrb[17].mxu1  ;;  %v1299_v55 = vsel %vm154_vm2, %v1292_v53, -inf }
 0x8c7   :  { %1300 = vmax.xlane.f32.xlu1 %v1299_v55 }
 0x8d8   :  { %1318 = vrot.lane.b32.xlu1 %v2056_v10, %s1965_s10 }
 0x8dc   :  { %1472 = vrot.lane.b32.xlu1 %v2132_v12, %s1951_s28  ;;  %v148_v12 = vld [vmem:[#allocation7 + $0x8] sm:$0xff] }
 0x8dd   :  { %v1793_v14 = vpack.c.bf16 %v148_v12, %v147_v11 }
 0x8e0   :  { %1474 = vrot.lane.b32.xlu1 %v2135_v17, %s1951_s28 }
 0x8e4   :  { %1482 = vrot.lane.b32.xlu1 %v1136_v51, %s1966_s11 }
 0x947   :  { %v1298_v8 = vpop.xlane.xlu0 %1297 }
 0x948   :  { %v1302_v56 = vsub.f32 %v1214_v48, %v1298_v8 }
 0x94a   :  { %v1304_v57 = vmul.f32 1.442695, %v1302_v56 }
 0x94c   :  { %1846 = vpow2.f32 %v1304_v57 }
 0x954   :  { %v1301_v58 = vpop.xlane.xlu1 %1300 }
 0x955   :  { %v1303_v59 = vsub.f32 %v1292_v53, %v1301_v58 }
 0x956   :  { %v1847_v60 = vpop.eup %1846 }
 0x957   :  { %v1306_v61 = vmul.f32 1.442695, %v1303_v59  ;;  %v1308_v62 = vsel %vm154_vm2, %v1847_v60, 0.0 }
 0x958   :  { %v1319_v63 = vpop.permute.xlu1 %1318  ;;  %1309 = vadd.xlane.f32.xlu0 %v1308_v62 }
 0x959   :  { %1848 = vpow2.f32 %v1306_v61  ;;  %1765 = vmatpush3.msra.mxu0 %v1319_v63 }
 0x95a   :  { %1794 = vmatprep.subr.bf16.mxu0 %v1793_v14 }
 0x95c   :  { %v1473_v20 = vpop.permute.xlu1 %1472 }
 0x95d   :  { %v1494_v22 = vsel %vm154_vm2, %v2101_v44, %v1473_v20  ;;  %v1636_v44 = vld [vmem:[%s2205_s3] ss:$0 sm:$0xff] }
 0x960   :  { %v1475_v26 = vpop.permute.xlu1 %1474 }
 0x961   :  { %v1495_v28 = vsel %vm154_vm2, %v2103_v46, %v1475_v26 }
 0x963   :  { %v1849_v10 = vpop.eup %1848 }
 0x964   :  { %v1311_v0 = vsel %vm154_vm2, %v1849_v10, 0.0  ;;  %v1483_v27 = vpop.permute.xlu1 %1482 }
 0x965   :  { %1312 = vadd.xlane.f32.xlu0 %v1311_v0  ;;  %v1498_v29 = vsel %vm1496_vm4, %v1495_v28, %v1483_v27 }
 0x97b   :  { %1394 = vrot.lane.b32.xlu0 %v2054_v9, %s1965_s10  ;;  %v150_v9 = vld [vmem:[#allocation7 + $0x18] sm:$0xff] }
 0x97c   :  { %v1797_v15 = vpack.c.bf16 %v150_v9, %v149_v13 }
 0x97f   :  { %1480 = vrot.lane.b32.xlu0 %v1060_v45, %s1966_s11 }
 0x9e5   :  { %v1310_v1 = vpop.xlane.xlu0 %1309 }
 0x9e6   :  { %1850 = vrcp.f32 %v1310_v1 }
 0x9f0   :  { %v1851_v2 = vpop.eup %1850 }
 0x9f1   :  { %v1316_v3 = vmul.f32 %v1851_v2, %v1847_v60 }
 0x9f2   :  { %v1313_v4 = vpop.xlane.xlu0 %1312 }
 0x9f3   :  { %1852 = vrcp.f32 %v1313_v4  ;;  %1767 = vmatmul.mubr.msk.f32.vlgmr.msra.gmra.mrb[12].mxu0 %vm154_vm2, %v1316_v3 }
 0x9f4   :  { %1796 = vmatpush3.bf16.msra.mxu0 %v1793_v14 }
 0x9f5   :  { %1798 = vmatprep.subr.bf16.mxu0 %v1797_v15 }
 0x9f6   :  { %v1395_v5 = vpop.permute.xlu0 %1394 }
 0x9f7   :  { %1770 = vmatpush3.msra.mxu1 %v1395_v5 }
 0x9f8   :  { %1800 = vmatpush3.bf16.msra.mxu0 %v1797_v15 }
 0x9fa   :  { %v1481_v21 = vpop.permute.xlu0 %1480 }
 0x9fb   :  { %v1497_v23 = vsel %vm1496_vm4, %v1494_v22, %v1481_v21 }
 0x9fd   :  { %v1853_v6 = vpop.eup %1852 }
 0x9fe   :  { %v1317_v7 = vmul.f32 %v1853_v6, %v1849_v10 }
 0xa00   :  { %1772 = vmatmul.mubr.msk.f32.vlgmr.msra.gmra.mrb[18].mxu1 %vm154_vm2, %v1317_v7 }
 0xac6   :  { %v1390_v16 = vpop.f32.mrb[12].mxu0 }
 0xac7   :  { %1488 = vrot.lane.b32.xlu0 %v1390_v16, %s1967_s12  ;;  %v1768_v17 = vpop.f32.mrb[13].mxu0 }
 0xad3   :  { %v1466_v18 = vpop.f32.mrb[18].mxu1 }
 0xad4   :  { %1490 = vrot.lane.b32.xlu1 %v1466_v18, %s1967_s12  ;;  %v1773_v19 = vpop.f32.mrb[19].mxu1 }
 0xb39   :  { %v1489_v24 = vpop.permute.xlu0 %1488 }
 0xb3a   :  { %v1500_v25 = vsel %vm1499_vm3, %v1497_v23, %v1489_v24 }
 0xb3b   :  { %1782 = vmatprep.mubr.msk.f32.mxu0 %vm65_vm0, %v1500_v25 }
 0xb46   :  { %v1491_v30 = vpop.permute.xlu1 %1490 }
 0xb47   :  { %v1501_v31 = vsel %vm1499_vm3, %v1498_v29, %v1491_v30 }
 0xb48   :  { %1783 = vmatmul.mubr.msk.f32.vlgmr.msra.gmra.mrb[14].mxu0 %vm65_vm0, %v1501_v31 }
 0xc1b   :  { %v1784_v32 = vpop.f32.mrb[14].mxu0 }
 0xc1c   :  { %v1587_v33 = vadd.f32 %v1784_v32, %v1636_v44  ;;  %v1581_v34 = vpop.f32.mrb[15].mxu0 }
 0xc1d   :  { %v1582_v35 = vadd.f32 %v1636_v44, %v1581_v34 }
 0xc1e   :  { %1591 = vst.msk [vmem:[#allocation8 + $0x8] sm:$0xff] %vm65_vm0, %v1587_v33 }
 0xc1f   :  { %1590 = vst.msk [vmem:[#allocation8] sm:$0xff] %vm65_vm0, %v1582_v35 }
 0xc20   :  { %1931 = shalt.err (!%p1928_p0)
}
 0xc21   :  { %s1932_s19 = scalar_lea.hbm %s2206_s4, 256 }
 0xc22   :  { %p1933_p1 = scmp.ne.s32.totalorder %s2206_s4, %s1932_s19  ;;  %p1936_p2 = scmp.lt.u32.totalorder %s1932_s19, %s2206_s4 }
 0xc24   :  { %p1938_p3 = pnand %p1936_p2, %p1933_p1 }
 0xc26   :  { %1941 = shalt.err (!%p1938_p3)
}
 0xc27   :  { %1603 = dma.vmem_to_hbm [thread:$0]  %s1598_s15, 256, %s2206_s4, [#allocation4], %s1950_s27, %s1950_s27, %s1951_s28  }
 0xc28   :  { %1946 = dma.done.wait [#allocation4], 256  }
 0xc29   :  { %1947 = vsyncadd [#allocation4], 4294967040 }
 0xc2a   :  { %1607 = vsyncpa [#allocation3], 1 }
 0xc2b   :  { %1608 = vsyncpa [#allocation6], 1 }
 0xc2c   :  { %1609 = vsyncpa [#allocation4], 1 }

// kernel: tpu_custom_call.1
= control target key start
LH: loop header
LB: loop body
LE: loop exit
PB: predicated region body
PF: predicated region fallthrough
CT: control target
= control target key end

     0   :  { %9 = vsyncpa [#allocation3], 0  ;;  %s2434_s0 = inlined_call_operand.hbm [shape: f32[2,8,32], index: 0, kind: input, shape index: {}]   ;;  %s2435_s1 = inlined_call_operand.hbm [shape: f32[32,96], index: 1, kind: input, shape index: {}]   ;;  %s2436_s2 = inlined_call_operand.hbm [shape: f32[32,32], index: 2, kind: input, shape index: {}]   ;;  %s2437_s3 = inlined_call_operand.vmem [shape: f32[1,32], index: 3, kind: input, shape index: {}]   ;;  %s2438_s4 = inlined_call_operand.hbm [shape: f32[2,8,32], index: 4, kind: output, shape index: {}]  }
   0x1   :  { %10 = vsyncpa [#allocation6], 0 }
   0x2   :  { %11 = vsyncpa [#allocation4], 0  ;;  %s2182_s15 = smov [#allocation5]   ;;  %s2183_s17 = smov [#allocation2]  }
   0x3   :  { %s29_s16 = sshll.u32 %s2182_s15, 4  ;;  %s17_s18 = sshll.u32 %s2183_s17, 4  ;;  %s30_s16 = int_to_ptr.vmem [resolvable:$true] %s29_s16  ;;  %s2226_s18 = int_to_ptr.vmem [resolvable:$true] %s17_s18 }
   0x4   :  { %s2088_s21 = scalar_lea.hbm %s2435_s1, 512 }
   0x5   :  { %p2089_p0 = scmp.ne.s32.totalorder %s2435_s1, %s2088_s21  ;;  %p2092_p1 = scmp.lt.u32.totalorder %s2088_s21, %s2435_s1 }
   0x7   :  { %p2094_p2 = pnand %p2092_p1, %p2089_p0 }
   0x9   :  { %2097 = shalt.err (!%p2094_p2)
}
   0xa   :  { %s2098_s26 = scalar_lea.vmem %s30_s16, 512  ;;  %p2103_p4 = scmp.lt.s32.totalorder %s30_s16, %s30_s16 }
   0xb   :  { %p2099_p3 = scmp.ne.s32.totalorder %s30_s16, %s2098_s26  ;;  %p2104_p5 = scmp.lt.s32.totalorder %s2098_s26, %s2098_s26 }
   0xd   :  { %p2105_p6 = por %p2104_p5, %p2103_p4 }
   0xf   :  { %p2106_p7 = pnand %p2105_p6, %p2099_p3 }
  0x11   :  { %2109 = shalt.err (!%p2106_p7)
}
  0x12   :  { %s2184_s27 = smov 128   ;;  %s2185_s28 = smov 8  }
  0x13   :  { %35 = dma.hbm_to_vmem [thread:$0]  %s2435_s1, 512, %s30_s16, [#allocation6], %s2184_s27, %s2184_s27, %s2185_s28  }
  0x14   :  { %s2110_s7 = scalar_lea.hbm %s2434_s0, 256 }
  0x15   :  { %p2111_p8 = scmp.ne.s32.totalorder %s2434_s0, %s2110_s7  ;;  %p2114_p9 = scmp.lt.u32.totalorder %s2110_s7, %s2434_s0 }
  0x17   :  { %p2116_p10 = pnand %p2114_p9, %p2111_p8 }
  0x19   :  { %2119 = shalt.err (!%p2116_p10)
}
  0x1a   :  { %s2120_s12 = scalar_lea.vmem %s2226_s18, 256  ;;  %p2125_p12 = scmp.lt.s32.totalorder %s2226_s18, %s2226_s18 }
  0x1b   :  { %p2121_p11 = scmp.ne.s32.totalorder %s2226_s18, %s2120_s12  ;;  %p2126_p13 = scmp.lt.s32.totalorder %s2120_s12, %s2120_s12 }
  0x1d   :  { %p2127_p0 = por %p2126_p13, %p2125_p12 }
  0x1f   :  { %p2128_p1 = pnand %p2127_p0, %p2121_p11 }
  0x21   :  { %2131 = shalt.err (!%p2128_p1)
}
  0x22   :  { %23 = dma.hbm_to_vmem [thread:$0]  %s2434_s0, 256, %s2226_s18, [#allocation3], %s2184_s27, %s2184_s27, %s2185_s28  }
  0x23   :  { %s2186_s14 = smov [#allocation7]   ;;  %s2132_s19 = scalar_lea.hbm %s2436_s2, 512 }
  0x24   :  { %s41_s15 = sshll.u32 %s2186_s14, 4  ;;  %p2133_p2 = scmp.ne.s32.totalorder %s2436_s2, %s2132_s19  ;;  %s42_s15 = int_to_ptr.vmem [resolvable:$true] %s41_s15 }
  0x25   :  { %p2136_p3 = scmp.lt.u32.totalorder %s2132_s19, %s2436_s2 }
  0x27   :  { %p2138_p4 = pnand %p2136_p3, %p2133_p2 }
  0x29   :  { %2141 = shalt.err (!%p2138_p4)
}
  0x2a   :  { %s2142_s24 = scalar_lea.vmem %s42_s15, 512  ;;  %p2147_p6 = scmp.lt.s32.totalorder %s42_s15, %s42_s15 }
  0x2b   :  { %p2143_p5 = scmp.ne.s32.totalorder %s42_s15, %s2142_s24  ;;  %p2148_p7 = scmp.lt.s32.totalorder %s2142_s24, %s2142_s24 }
  0x2d   :  { %p2149_p8 = por %p2148_p7, %p2147_p6 }
  0x2f   :  { %p2150_p9 = pnand %p2149_p8, %p2143_p5 }
  0x31   :  { %2153 = shalt.err (!%p2150_p9)
}
  0x32   :  { %47 = dma.hbm_to_vmem [thread:$0]  %s2436_s2, 512, %s42_s15, [#allocation6], %s2184_s27, %s2184_s27, %s2185_s28  }
  0x33   :  { %2176 = dma.done.wait [#allocation3], 256  }
  0x34   :  { %2177 = vsyncadd [#allocation3], 4294967040 }
  0x35   :  { %2178 = dma.done.wait [#allocation6], 1024  }
  0x36   :  { %2179 = vsyncadd [#allocation6], 4294966272  ;;  %vm65_vm0 = vcmask 261120   ;;  %v61_v0 = vld [vmem:[#allocation5] sm:$0xff]  ;;  %v62_v1 = vld [vmem:[#allocation5 + $0x8] sm:$0xff]  ;;  %v2187_v8 = vmov 0.0  }
  0x37   :  { %v63_v2 = vld [vmem:[#allocation5 + $0x10] sm:$0xff]  ;;  %v2023_v3 = vpack.c.bf16 %v62_v1, %v61_v0  ;;  %v64_v4 = vld [vmem:[#allocation5 + $0x18] sm:$0xff]  ;;  %1923 = vmatprep.subr.mxu1 %v2187_v8  ;;  %vm2188_vm1 = vmmov 0   ;;  %s2189_s2 = smov 96   ;;  %vm154_vm2 = vcmask 64512   ;;  %s2190_s25 = smov 64  }
  0x38   :  { %v59_v5 = vld [vmem:[#allocation2] sm:$0xff]  ;;  %v2027_v6 = vpack.c.bf16 %v64_v4, %v63_v2  ;;  %v60_v7 = vld [vmem:[#allocation2 + $0x8] sm:$0xff]  ;;  %1925 = vmatprep.mubr.msk.f32.mxu1 %vm2188_vm1, %v2187_v8  ;;  %s2191_s26 = smov 88   ;;  %s2192_s29 = smov 120  }
  0x39   :  { %1920 = vmatprep.mubr.msk.f32.mxu0 %vm65_vm0, %v59_v5  ;;  %2024 = vmatprep.subr.bf16.mxu0 %v2023_v3  ;;  %s2193_s30 = smov 56   ;;  %s2194_s5 = smov 112  }
  0x3a   :  { %2026 = vmatpush3.bf16.msra.mxu0 %v2023_v3  ;;  %s2195_s6 = smov 80   ;;  %s2196_s7 = smov 48  }
  0x3b   :  { %2028 = vmatprep.subr.bf16.mxu0 %v2027_v6  ;;  %s2197_s8 = smov 72   ;;  %s2198_s9 = smov 104  }
  0x3c   :  { %s2199_s10 = smov 40   ;;  %s2200_s1 = smov [#allocation8]  }
  0x3d   :  { %s1814_s13 = sshll.u32 %s2200_s1, 4  ;;  %s1815_s13 = int_to_ptr.vmem [resolvable:$true] %s1814_s13 }
  0x3e   :  { %2030 = vmatpush3.bf16.msra.mxu0 %v2027_v6  ;;  %s2154_s14 = scalar_lea.vmem %s1815_s13, 256  ;;  %p2159_p11 = scmp.lt.s32.totalorder %s1815_s13, %s1815_s13 }
  0x3f   :  { %1943 = vmatprep.subr.mxu0 %v2187_v8  ;;  %p2155_p10 = scmp.ne.s32.totalorder %s1815_s13, %s2154_s14  ;;  %p2160_p12 = scmp.lt.s32.totalorder %s2154_s14, %s2154_s14 }
  0x41   :  { %1921 = vmatmul.mubr.msk.f32.vlgmr.msra.gmra.mrb[0].mxu0 %vm65_vm0, %v60_v7  ;;  %p2161_p13 = por %p2160_p12, %p2159_p11 }
  0x42   :  { %1945 = vmatprep.mubr.msk.f32.mxu0 %vm2188_vm1, %v2187_v8 }
  0x43   :  { %p2162_p0 = pnand %p2161_p13, %p2155_p10 }
 0x114   :  { %v2286_v9 = vpop.f32.mrb[0].mxu0 }
 0x115   :  { %v2288_v10 = vpop.f32.mrb[1].mxu0 }
 0x116   :  { %152 = vrot.lane.b32.xlu0 %v2288_v10, %s2189_s2 }
 0x11a   :  { %230 = vrot.lane.b32.xlu0 %v2286_v9, %s2189_s2 }
 0x188   :  { %v153_v11 = vpop.permute.xlu0 %152 }
 0x189   :  { %1924 = vmatpush3.xpose.msk.msra.mxu1 %vm154_vm2, %v153_v11 }
 0x18a   :  { %1928 = vmatprep.subr.mxu1 %v2187_v8 }
 0x18c   :  { %1926 = vmatmul.mubr.msk.f32.vlgmr.msra.gmra.mrb[0].mxu1 %vm154_vm2, %v2288_v10  ;;  %v231_v12 = vpop.permute.xlu0 %230 }
 0x18d   :  { %1929 = vmatpush3.xpose.msk.msra.mxu1 %vm154_vm2, %v231_v12  ;;  %1930 = vmatprep.mubr.msk.f32.mxu1 %vm2188_vm1, %v2187_v8 }
 0x18e   :  { %1933 = vmatprep.subr.mxu1 %v2187_v8 }
 0x190   :  { %1931 = vmatmul.mubr.msk.f32.vlgmr.msra.gmra.mrb[2].mxu1 %vm154_vm2, %v2286_v9 }
 0x191   :  { %1935 = vmatprep.mubr.msk.f32.mxu1 %vm2188_vm1, %v2187_v8 }
 0x25f   :  { %v225_v13 = vpop.f32.mrb[0].mxu1 }
 0x260   :  { %v1927_v14 = vpop.f32.mrb[1].mxu1  ;;  %v306_v15 = vsel %vm154_vm2, %v225_v13, -inf }
 0x261   :  { %307 = vmax.xlane.f32.xlu1 %v306_v15  ;;  %v147_v14 = vld [vmem:[#allocation7] sm:$0xff] }
 0x263   :  { %v302_v16 = vpop.f32.mrb[2].mxu1 }
 0x264   :  { %v1932_v17 = vpop.f32.mrb[3].mxu1  ;;  %v309_v18 = vsel %vm154_vm2, %v302_v16, -inf }
 0x265   :  { %310 = vmax.xlane.f32.xlu1 %v309_v18 }
 0x276   :  { %328 = vrot.lane.b32.xlu1 %v2288_v10, %s2190_s25 }
 0x27a   :  { %404 = vrot.lane.b32.xlu1 %v2286_v9, %s2190_s25 }
 0x27e   :  { %560 = vrot.lane.b32.xlu1 %v2286_v9, %s2191_s26 }
 0x2ee   :  { %v308_v19 = vpop.xlane.xlu1 %307 }
 0x2ef   :  { %v312_v20 = vsub.f32 %v225_v13, %v308_v19  ;;  %v148_v13 = vld [vmem:[#allocation7 + $0x8] sm:$0xff] }
 0x2f1   :  { %v314_v21 = vmul.f32 1.442695, %v312_v20 }
 0x2f2   :  { %v311_v22 = vpop.xlane.xlu1 %310 }
 0x2f3   :  { %2056 = vpow2.f32 %v314_v21  ;;  %v313_v23 = vsub.f32 %v302_v16, %v311_v22 }
 0x2f5   :  { %v316_v24 = vmul.f32 1.442695, %v313_v23 }
 0x2f6   :  { %v329_v25 = vpop.permute.xlu1 %328 }
 0x2f7   :  { %2058 = vpow2.f32 %v316_v24  ;;  %1934 = vmatpush3.msra.mxu1 %v329_v25 }
 0x2f8   :  { %1938 = vmatprep.subr.mxu1 %v2187_v8 }
 0x2fa   :  { %v405_v30 = vpop.permute.xlu1 %404 }
 0x2fd   :  { %v2057_v26 = vpop.eup %2056 }
 0x2fe   :  { %v318_v27 = vsel %vm154_vm2, %v2057_v26, 0.0  ;;  %v561_v31 = vpop.permute.xlu1 %560 }
 0x2ff   :  { %319 = vadd.xlane.f32.xlu0 %v318_v27 }
 0x301   :  { %v2059_v28 = vpop.eup %2058 }
 0x302   :  { %v321_v29 = vsel %vm154_vm2, %v2059_v28, 0.0 }
 0x303   :  { %322 = vadd.xlane.f32.xlu1 %v321_v29 }
 0x314   :  { %558 = vrot.lane.b32.xlu1 %v2286_v9, %s2192_s29 }
 0x315   :  { %482 = vrot.lane.b32.xlu0 %v2288_v10, %s2191_s26 }
 0x318   :  { %480 = vrot.lane.b32.xlu1 %v2288_v10, %s2192_s29 }
 0x38c   :  { %v320_v32 = vpop.xlane.xlu0 %319 }
 0x38d   :  { %2060 = vrcp.f32 %v320_v32 }
 0x390   :  { %v323_v33 = vpop.xlane.xlu1 %322  ;;  %v483_v34 = vpop.permute.xlu0 %482 }
 0x391   :  { %2062 = vrcp.f32 %v323_v33  ;;  %1944 = vmatpush3.xpose.msk.msra.mxu0 %vm154_vm2, %v483_v34 }
 0x392   :  { %1953 = vmatprep.subr.mxu0 %v2187_v8 }
 0x394   :  { %v559_v35 = vpop.permute.xlu1 %558 }
 0x397   :  { %v2061_v36 = vpop.eup %2060 }
 0x398   :  { %v326_v37 = vmul.f32 %v2061_v36, %v2057_v26  ;;  %v481_v38 = vpop.permute.xlu1 %480 }
 0x399   :  { %1946 = vmatmul.mubr.msk.f32.vlgmr.msra.gmra.mrb[2].mxu0 %vm154_vm2, %v481_v38 }
 0x39a   :  { %1936 = vmatmul.mubr.msk.f32.vlgmr.msra.gmra.mrb[4].mxu1 %vm154_vm2, %v326_v37  ;;  %1955 = vmatprep.mubr.msk.f32.mxu0 %vm2188_vm1, %v2187_v8  ;;  %v149_v37 = vld [vmem:[#allocation7 + $0x10] sm:$0xff] }
 0x39b   :  { %v2063_v39 = vpop.eup %2062  ;;  %1939 = vmatpush3.msra.mxu1 %v405_v30  ;;  %1940 = vmatprep.mubr.msk.f32.mxu1 %vm2188_vm1, %v2187_v8 }
 0x39c   :  { %v327_v40 = vmul.f32 %v2063_v39, %v2059_v28  ;;  %1948 = vmatprep.subr.mxu1 %v2187_v8 }
 0x39e   :  { %1941 = vmatmul.mubr.msk.f32.vlgmr.msra.gmra.mrb[6].mxu1 %vm154_vm2, %v327_v40 }
 0x39f   :  { %1950 = vmatprep.mubr.msk.f32.mxu1 %vm2188_vm1, %v2187_v8 }
 0x3a2   :  { %1949 = vmatpush3.xpose.msk.msra.mxu1 %vm154_vm2, %v561_v31 }
 0x3a3   :  { %1958 = vmatprep.subr.mxu1 %v2187_v8 }
 0x3a5   :  { %1951 = vmatmul.mubr.msk.f32.vlgmr.msra.gmra.mrb[8].mxu1 %vm154_vm2, %v559_v35 }
 0x3a6   :  { %1960 = vmatprep.mubr.msk.f32.mxu1 %vm2188_vm1, %v2187_v8 }
 0x46c   :  { %v554_v41 = vpop.f32.mrb[2].mxu0 }
 0x46d   :  { %v2332_v42 = vpop.f32.mrb[4].mxu1  ;;  %v1947_v43 = vpop.f32.mrb[3].mxu0  ;;  %v636_v50 = vsel %vm154_vm2, %v554_v41, -inf }
 0x46e   :  { %v1937_v44 = vpop.f32.mrb[5].mxu1 }
 0x471   :  { %v2334_v45 = vpop.f32.mrb[6].mxu1 }
 0x472   :  { %v1942_v46 = vpop.f32.mrb[7].mxu1 }
 0x478   :  { %v632_v47 = vpop.f32.mrb[8].mxu1 }
 0x479   :  { %v1952_v48 = vpop.f32.mrb[9].mxu1  ;;  %v639_v49 = vsel %vm154_vm2, %v632_v47, -inf }
 0x47a   :  { %640 = vmax.xlane.f32.xlu1 %v639_v49 }
 0x48b   :  { %734 = vrot.lane.b32.xlu1 %v2286_v9, %s2193_s30 }
 0x48f   :  { %972 = vrot.lane.b32.xlu1 %v2288_v10, %s2194_s5 }
 0x493   :  { %1052 = vrot.lane.b32.xlu1 %v2286_v9, %s2195_s6 }
 0x497   :  { %1050 = vrot.lane.b32.xlu1 %v2286_v9, %s2194_s5 }
 0x4bb   :  { %637 = vmax.xlane.f32.xlu1 %v636_v50 }
 0x507   :  { %v641_v51 = vpop.xlane.xlu1 %640 }
 0x508   :  { %v643_v52 = vsub.f32 %v632_v47, %v641_v51 }
 0x50a   :  { %v646_v53 = vmul.f32 1.442695, %v643_v52 }
 0x50b   :  { %v735_v54 = vpop.permute.xlu1 %734 }
 0x50c   :  { %2064 = vpow2.f32 %v646_v53  ;;  %1959 = vmatpush3.msra.mxu1 %v735_v54 }
 0x50d   :  { %1973 = vmatprep.subr.mxu1 %v2187_v8 }
 0x50f   :  { %v973_v57 = vpop.permute.xlu1 %972 }
 0x513   :  { %v1053_v58 = vpop.permute.xlu1 %1052 }
 0x516   :  { %v2065_v55 = vpop.eup %2064 }
 0x517   :  { %v651_v56 = vsel %vm154_vm2, %v2065_v55, 0.0  ;;  %v1051_v59 = vpop.permute.xlu1 %1050 }
 0x518   :  { %652 = vadd.xlane.f32.xlu0 %v651_v56 }
 0x52e   :  { %974 = vrot.lane.b32.xlu0 %v2288_v10, %s2195_s6 }
 0x548   :  { %v638_v60 = vpop.xlane.xlu1 %637 }
 0x549   :  { %v642_v61 = vsub.f32 %v554_v41, %v638_v60 }
 0x54b   :  { %v644_v62 = vmul.f32 1.442695, %v642_v61 }
 0x54d   :  { %2066 = vpow2.f32 %v644_v62 }
 0x557   :  { %v2067_v63 = vpop.eup %2066 }
 0x558   :  { %v648_v0 = vsel %vm154_vm2, %v2067_v63, 0.0 }
 0x559   :  { %649 = vadd.xlane.f32.xlu0 %v648_v0 }
 0x56f   :  { %658 = vrot.lane.b32.xlu0 %v2288_v10, %s2193_s30 }
 0x573   :  { %1226 = vrot.lane.b32.xlu0 %v2286_v9, %s2196_s7 }
 0x577   :  { %1387 = vrot.lane.b32.xlu0 %v2288_v10, %s2197_s8 }
 0x57b   :  { %1465 = vrot.lane.b32.xlu0 %v2286_v9, %s2197_s8 }
 0x57f   :  { %1385 = vrot.lane.b32.xlu0 %v2288_v10, %s2198_s9 }
 0x5a5   :  { %v653_v1 = vpop.xlane.xlu0 %652 }
 0x5a6   :  { %2068 = vrcp.f32 %v653_v1 }
 0x5a9   :  { %v975_v4 = vpop.permute.xlu0 %974 }
 0x5b0   :  { %v2069_v2 = vpop.eup %2068 }
 0x5b1   :  { %v657_v3 = vmul.f32 %v2069_v2, %v2065_v55 }
 0x5b3   :  { %1961 = vmatmul.mubr.msk.f32.vlgmr.msra.gmra.mrb[10].mxu1 %vm154_vm2, %v657_v3 }
 0x5b4   :  { %1974 = vmatpush3.xpose.msk.msra.mxu1 %vm154_vm2, %v975_v4  ;;  %1975 = vmatprep.mubr.msk.f32.mxu1 %vm2188_vm1, %v2187_v8 }
 0x5b5   :  { %1978 = vmatprep.subr.mxu1 %v2187_v8 }
 0x5b7   :  { %1976 = vmatmul.mubr.msk.f32.vlgmr.msra.gmra.mrb[12].mxu1 %vm154_vm2, %v973_v57 }
 0x5b8   :  { %1979 = vmatpush3.xpose.msk.msra.mxu1 %vm154_vm2, %v1053_v58  ;;  %1980 = vmatprep.mubr.msk.f32.mxu1 %vm2188_vm1, %v2187_v8 }
 0x5b9   :  { %1988 = vmatprep.subr.mxu1 %v2187_v8 }
 0x5bb   :  { %1981 = vmatmul.mubr.msk.f32.vlgmr.msra.gmra.mrb[14].mxu1 %vm154_vm2, %v1051_v59 }
 0x5bc   :  { %1990 = vmatprep.mubr.msk.f32.mxu1 %vm2188_vm1, %v2187_v8 }
 0x5e6   :  { %v650_v5 = vpop.xlane.xlu0 %649 }
 0x5e7   :  { %2070 = vrcp.f32 %v650_v5 }
 0x5ea   :  { %v659_v6 = vpop.permute.xlu0 %658 }
 0x5eb   :  { %1954 = vmatpush3.msra.mxu0 %v659_v6 }
 0x5ec   :  { %1963 = vmatprep.subr.mxu0 %v148_v13 }
 0x5ee   :  { %v1227_v7 = vpop.permute.xlu0 %1226 }
 0x5ef   :  { %1989 = vmatpush3.msra.mxu1 %v1227_v7 }
 0x5f0   :  { %1998 = vmatprep.subr.mxu1 %v2187_v8 }
 0x5f1   :  { %v2071_v11 = vpop.eup %2070 }
 0x5f2   :  { %v656_v12 = vmul.f32 %v2071_v11, %v2067_v63  ;;  %v1388_v39 = vpop.permute.xlu0 %1387 }
 0x5f4   :  { %1956 = vmatmul.mubr.msk.f32.vlgmr.msra.gmra.mrb[4].mxu0 %vm154_vm2, %v656_v12 }
 0x5f5   :  { %1964 = vmatpush3.msra.mxu0 %v148_v13 }
 0x5f6   :  { %1968 = vmatprep.subr.mxu0 %v147_v14  ;;  %v1466_v43 = vpop.permute.xlu0 %1465 }
 0x686   :  { %v806_v15 = vpop.f32.mrb[10].mxu1 }
 0x687   :  { %v1962_v16 = vpop.f32.mrb[11].mxu1 }
 0x68a   :  { %v1046_v17 = vpop.f32.mrb[12].mxu1 }
 0x68b   :  { %v1977_v18 = vpop.f32.mrb[13].mxu1  ;;  %v1128_v19 = vsel %vm154_vm2, %v1046_v17, -inf }
 0x68c   :  { %1129 = vmax.xlane.f32.xlu1 %v1128_v19 }
 0x68e   :  { %v1124_v20 = vpop.f32.mrb[14].mxu1 }
 0x68f   :  { %v1982_v21 = vpop.f32.mrb[15].mxu1  ;;  %v1131_v22 = vsel %vm154_vm2, %v1124_v20, -inf }
 0x690   :  { %1132 = vmax.xlane.f32.xlu1 %v1131_v22 }
 0x6c7   :  { %v730_v23 = vpop.f32.mrb[4].mxu0 }
 0x6c8   :  { %v1957_v24 = vpop.f32.mrb[5].mxu0  ;;  %1965 = vmatprep.mubr.msk.f32.mxu0 %vm154_vm2, %v730_v23 }
 0x6c9   :  { %1966 = vmatmul.mubr.msk.f32.vlgmr.msra.gmra.mrb[6].mxu0 %vm154_vm2, %v806_v15 }
 0x6ca   :  { %1970 = vmatprep.mubr.msk.f32.mxu0 %vm154_vm2, %v2332_v42  ;;  %1969 = vmatpush3.msra.mxu0 %v147_v14 }
 0x6cb   :  { %1983 = vmatprep.subr.mxu0 %v2187_v8 }
 0x6d1   :  { %1971 = vmatmul.mubr.msk.f32.vlgmr.msra.gmra.mrb[6].mxu0 %vm154_vm2, %v2334_v45  ;;  %v1386_v45 = vpop.permute.xlu0 %1385 }
 0x6d2   :  { %1985 = vmatprep.mubr.msk.f32.mxu0 %vm2188_vm1, %v2187_v8 }
 0x719   :  { %v1130_v25 = vpop.xlane.xlu1 %1129 }
 0x71a   :  { %v1134_v26 = vsub.f32 %v1046_v17, %v1130_v25 }
 0x71c   :  { %v1136_v27 = vmul.f32 1.442695, %v1134_v26 }
 0x71d   :  { %v1133_v28 = vpop.xlane.xlu1 %1132 }
 0x71e   :  { %2072 = vpow2.f32 %v1136_v27  ;;  %v1135_v29 = vsub.f32 %v1124_v20, %v1133_v28 }
 0x720   :  { %v1138_v30 = vmul.f32 1.442695, %v1135_v29 }
 0x722   :  { %2074 = vpow2.f32 %v1138_v30 }
 0x728   :  { %v2073_v31 = vpop.eup %2072 }
 0x729   :  { %v1140_v32 = vsel %vm154_vm2, %v2073_v31, 0.0 }
 0x72a   :  { %1141 = vadd.xlane.f32.xlu1 %v1140_v32 }
 0x72c   :  { %v2075_v33 = vpop.eup %2074 }
 0x72d   :  { %v1143_v34 = vsel %vm154_vm2, %v2075_v33, 0.0 }
 0x72e   :  { %1144 = vadd.xlane.f32.xlu1 %v1143_v34 }
 0x73f   :  { %1150 = vrot.lane.b32.xlu1 %v2288_v10, %s2196_s7 }
 0x743   :  { %1463 = vrot.lane.b32.xlu1 %v2286_v9, %s2198_s9 }
 0x7b7   :  { %v1142_v35 = vpop.xlane.xlu1 %1141 }
 0x7b8   :  { %2076 = vrcp.f32 %v1142_v35 }
 0x7bb   :  { %v1145_v36 = vpop.xlane.xlu1 %1144 }
 0x7bc   :  { %2078 = vrcp.f32 %v1145_v36 }
 0x7bf   :  { %v1151_v38 = vpop.permute.xlu1 %1150 }
 0x7c0   :  { %1984 = vmatpush3.msra.mxu0 %v1151_v38 }
 0x7c1   :  { %1993 = vmatprep.subr.mxu0 %v149_v37 }
 0x7c2   :  { %v2077_v40 = vpop.eup %2076 }
 0x7c3   :  { %v1148_v41 = vmul.f32 %v2077_v40, %v2073_v31  ;;  %v1464_v50 = vpop.permute.xlu1 %1463 }
 0x7c5   :  { %1986 = vmatmul.mubr.msk.f32.vlgmr.msra.gmra.mrb[8].mxu0 %vm154_vm2, %v1148_v41 }
 0x7c6   :  { %v2079_v42 = vpop.eup %2078  ;;  %1994 = vmatpush3.msra.mxu0 %v149_v37 }
 0x7c7   :  { %v1149_v44 = vmul.f32 %v2079_v42, %v2075_v33  ;;  %2003 = vmatprep.subr.mxu0 %v2187_v8 }
 0x7c9   :  { %1991 = vmatmul.mubr.msk.f32.vlgmr.msra.gmra.mrb[16].mxu1 %vm154_vm2, %v1149_v44 }
 0x7ca   :  { %1999 = vmatpush3.xpose.msk.msra.mxu1 %vm154_vm2, %v1388_v39  ;;  %2000 = vmatprep.mubr.msk.f32.mxu1 %vm2188_vm1, %v2187_v8 }
 0x7cb   :  { %2008 = vmatprep.subr.mxu1 %v2187_v8 }
 0x7cd   :  { %2001 = vmatmul.mubr.msk.f32.vlgmr.msra.gmra.mrb[18].mxu1 %vm154_vm2, %v1386_v45 }
 0x7ce   :  { %2010 = vmatprep.mubr.msk.f32.mxu1 %vm2188_vm1, %v2187_v8 }
 0x898   :  { %v1222_v46 = vpop.f32.mrb[8].mxu0 }
 0x899   :  { %v1987_v47 = vpop.f32.mrb[9].mxu0  ;;  %1995 = vmatprep.mubr.msk.f32.mxu0 %vm154_vm2, %v1222_v46 }
 0x89c   :  { %v1298_v48 = vpop.f32.mrb[16].mxu1 }
 0x89d   :  { %v1992_v49 = vpop.f32.mrb[17].mxu1  ;;  %1996 = vmatmul.mubr.msk.f32.vlgmr.msra.gmra.mrb[6].mxu0 %vm154_vm2, %v1298_v48 }
 0x89e   :  { %2004 = vmatpush3.xpose.msk.msra.mxu0 %vm154_vm2, %v1466_v43  ;;  %2005 = vmatprep.mubr.msk.f32.mxu0 %vm2188_vm1, %v2187_v8 }
 0x89f   :  { %2013 = vmatprep.subr.mxu0 %v2187_v8 }
 0x8a0   :  { %v1459_v51 = vpop.f32.mrb[18].mxu1 }
 0x8a1   :  { %v2002_v52 = vpop.f32.mrb[19].mxu1  ;;  %2006 = vmatmul.mubr.msk.f32.vlgmr.msra.gmra.mrb[10].mxu0 %vm154_vm2, %v1464_v50  ;;  %v1541_v53 = vsel %vm154_vm2, %v1459_v51, -inf }
 0x8a2   :  { %1542 = vmax.xlane.f32.xlu0 %v1541_v53  ;;  %2015 = vmatprep.mubr.msk.f32.mxu0 %vm2188_vm1, %v2187_v8 }
 0x92f   :  { %v1543_v54 = vpop.xlane.xlu0 %1542 }
 0x930   :  { %v1547_v55 = vsub.f32 %v1459_v51, %v1543_v54 }
 0x932   :  { %v1549_v56 = vmul.f32 1.442695, %v1547_v55 }
 0x934   :  { %2080 = vpow2.f32 %v1549_v56 }
 0x93e   :  { %v2081_v57 = vpop.eup %2080 }
 0x93f   :  { %v1553_v58 = vsel %vm154_vm2, %v2081_v57, 0.0 }
 0x940   :  { %1554 = vadd.xlane.f32.xlu0 %v1553_v58 }
 0x974   :  { %v1537_v59 = vpop.f32.mrb[10].mxu0 }
 0x975   :  { %v2007_v60 = vpop.f32.mrb[11].mxu0  ;;  %v1544_v61 = vsel %vm154_vm2, %v1537_v59, -inf }
 0x976   :  { %1545 = vmax.xlane.f32.xlu1 %v1544_v61 }
 0x987   :  { %1563 = vrot.lane.b32.xlu1 %v2288_v10, %s2199_s10  ;;  %v150_v10 = vld [vmem:[#allocation7 + $0x18] sm:$0xff] }
 0x9cd   :  { %v1555_v62 = vpop.xlane.xlu0 %1554 }
 0x9ce   :  { %2082 = vrcp.f32 %v1555_v62 }
 0x9d8   :  { %v2083_v8 = vpop.eup %2082 }
 0x9d9   :  { %v1561_v2 = vmul.f32 %v2083_v8, %v2081_v57 }
 0xa03   :  { %v1546_v63 = vpop.xlane.xlu1 %1545 }
 0xa04   :  { %v1548_v0 = vsub.f32 %v1537_v59, %v1546_v63 }
 0xa06   :  { %v1551_v1 = vmul.f32 1.442695, %v1548_v0 }
 0xa07   :  { %v1564_v3 = vpop.permute.xlu1 %1563 }
 0xa08   :  { %2084 = vpow2.f32 %v1551_v1  ;;  %2009 = vmatpush3.msra.mxu1 %v1564_v3 }
 0xa09   :  { %2011 = vmatmul.mubr.msk.f32.vlgmr.msra.gmra.mrb[20].mxu1 %vm154_vm2, %v1561_v2 }
 0xa12   :  { %v2085_v4 = vpop.eup %2084 }
 0xa13   :  { %v1556_v5 = vsel %vm154_vm2, %v2085_v4, 0.0 }
 0xa14   :  { %1557 = vadd.xlane.f32.xlu0 %v1556_v5 }
 0xa2a   :  { %1639 = vrot.lane.b32.xlu0 %v2286_v9, %s2199_s10  ;;  %v1861_v9 = vld [vmem:[%s2437_s3] ss:$0 sm:$0xff] }
 0xaa1   :  { %v1558_v6 = vpop.xlane.xlu0 %1557 }
 0xaa2   :  { %2086 = vrcp.f32 %v1558_v6 }
 0xaa5   :  { %v1640_v7 = vpop.permute.xlu0 %1639 }
 0xaa6   :  { %2014 = vmatpush3.msra.mxu0 %v1640_v7 }
 0xaa7   :  { %2018 = vmatprep.subr.mxu0 %v150_v10 }
 0xaac   :  { %v2087_v11 = vpop.eup %2086 }
 0xaad   :  { %v1562_v12 = vmul.f32 %v2087_v11, %v2085_v4 }
 0xaaf   :  { %2016 = vmatmul.mubr.msk.f32.vlgmr.msra.gmra.mrb[12].mxu0 %vm154_vm2, %v1562_v12 }
 0xab0   :  { %2019 = vmatpush3.msra.mxu0 %v150_v10 }
 0xadc   :  { %v1635_v13 = vpop.f32.mrb[20].mxu1 }
 0xadd   :  { %v2012_v14 = vpop.f32.mrb[21].mxu1  ;;  %2020 = vmatprep.mubr.msk.f32.mxu0 %vm154_vm2, %v1635_v13 }
 0xb82   :  { %v1711_v15 = vpop.f32.mrb[12].mxu0 }
 0xb83   :  { %v2017_v16 = vpop.f32.mrb[13].mxu0  ;;  %2021 = vmatmul.mubr.msk.f32.vlgmr.msra.gmra.mrb[6].mxu0 %vm154_vm2, %v1711_v15 }
 0xc56   :  { %v2022_v17 = vpop.f32.mrb[6].mxu0 }
 0xc57   :  { %v1806_v18 = vadd.f32 %v2022_v17, %v1861_v9  ;;  %v1787_v19 = vpop.f32.mrb[7].mxu0 }
 0xc58   :  { %v1805_v20 = vadd.f32 %v1861_v9, %v1787_v19 }
 0xc59   :  { %1808 = vst.msk [vmem:[#allocation8 + $0x8] sm:$0xff] %vm65_vm0, %v1806_v18 }
 0xc5a   :  { %1807 = vst.msk [vmem:[#allocation8] sm:$0xff] %vm65_vm0, %v1805_v20 }
 0xc5b   :  { %2165 = shalt.err (!%p2162_p0)
}
 0xc5c   :  { %s2166_s16 = scalar_lea.hbm %s2438_s4, 256 }
 0xc5d   :  { %p2167_p1 = scmp.ne.s32.totalorder %s2438_s4, %s2166_s16  ;;  %p2170_p2 = scmp.lt.u32.totalorder %s2166_s16, %s2438_s4 }
 0xc5f   :  { %p2172_p3 = pnand %p2170_p2, %p2167_p1 }
 0xc61   :  { %2175 = shalt.err (!%p2172_p3)
}
 0xc62   :  { %1820 = dma.vmem_to_hbm [thread:$0]  %s1815_s13, 256, %s2438_s4, [#allocation4], %s2184_s27, %s2184_s27, %s2185_s28  }
 0xc63   :  { %2180 = dma.done.wait [#allocation4], 256  }
 0xc64   :  { %2181 = vsyncadd [#allocation4], 4294967040 }
 0xc65   :  { %1824 = vsyncpa [#allocation3], 1 }
 0xc66   :  { %1825 = vsyncpa [#allocation6], 1 }
 0xc67   :  { %1826 = vsyncpa [#allocation4], 1 }

</bundles_post_ra>
